<compile_context>
chip_gen: v5e
topology: v5e:2x2
jax: 0.10.0
libtpu: 0.0.40
codegen_flags: <defaults>
</compile_context>

<pallas_src>
import functools

import jax
import jax.numpy as jnp
from jax.experimental import pallas as pl
from jax.experimental.pallas import tpu as pltpu


# --------------------------------------------------------------------------- #
# Fused kernel: conv1 + bias + ReLU + conv2 + bias + ReLU, intermediate on-chip.
# --------------------------------------------------------------------------- #
def _fused_backbone_kernel(xb_ref, w1_ref, b1_ref, w2_hbm_ref, b2_ref,
                           o_ref, w2_vmem, w2_sem, *, n_imgs, ho1, ho2):
    # xb_ref    : (N*Ho1, KH1*W*C0)      row-im2col'd input band (VMEM)
    # w1_ref    : (KH1*W*C0, Wo1*C1)     conv1 Toeplitz-band weights, K-folded (VMEM)
    # b1_ref    : (1, Wo1*C1)
    # w2_hbm_ref: (KH2, Wo1*C1, Wo2*C2)  conv2 band weights -- left in HBM
    # b2_ref    : (1, Wo2*C2)
    # o_ref     : (N*Ho2, Wo2*C2)
    # w2_vmem   : VMEM scratch for w2;  w2_sem: DMA completion semaphore

    # Kick off the largest transfer (w2, ~750 KiB) immediately so it lands while
    # conv1 runs.  All other (small) operands were auto-DMA'd by their BlockSpecs.
    w2_copy = pltpu.make_async_copy(w2_hbm_ref, w2_vmem, w2_sem)
    w2_copy.start()

    # ---- conv1 + bias + ReLU: one batch-folded, K-folded GEMM (K = KH1*W*C0).
    h1 = jnp.dot(xb_ref[...], w1_ref[...], preferred_element_type=jnp.float32)
    h1 = jnp.maximum(h1 + b1_ref[...], 0.0)          # (N*Ho1, Wo1*C1) stays on-chip

    w2_copy.wait()                                   # w2 now resident in VMEM

    # ---- conv2 + bias + ReLU: one dot per kernel row, batch folded into M.
    kh2 = w2_vmem.shape[0]

    def window(k):
        # Rows [k, k+Ho2) of every image's h1, stacked along the M dimension.
        return jnp.concatenate(
            [h1[n * ho1 + k: n * ho1 + k + ho2, :] for n in range(n_imgs)],
            axis=0)

    acc = jnp.dot(window(0), w2_vmem[0], preferred_element_type=jnp.float32)
    for k in range(1, kh2):                           # tiny static loop -> unrolled
        acc += jnp.dot(window(k), w2_vmem[k],
                       preferred_element_type=jnp.float32)
    o_ref[...] = jnp.maximum(acc + b2_ref[...], 0.0).astype(o_ref.dtype)


# --------------------------------------------------------------------------- #
# One-time parameter re-layout (done once, outside the jitted forward).
# --------------------------------------------------------------------------- #
def _toeplitz_weight(w_oihw, in_w):
    """PyTorch OIHW conv weight -> (KH, W_in*Cin, W_out*Cout) band matrices.

    t[kh, w*Cin+ci, wo*Cout+co] = w[co, ci, kh, w-wo] for 0 <= w-wo < KW, else 0,
    so that   out[ho, (wo, co)] = sum_kh  x_rows[ho+kh, (w, ci)] @ t[kh]
    is exactly the stride-1 'valid' cross-correlation nn.Conv2d computes.
    """
    cout, cin, kh, kw = w_oihw.shape
    w_out = in_w - kw + 1
    w_hwio = jnp.transpose(w_oihw, (2, 3, 1, 0)).astype(jnp.float32)  # (KH,KW,Cin,Cout)
    j = jnp.arange(in_w)[:, None] - jnp.arange(w_out)[None, :]        # (W_in, W_out)
    valid = (j >= 0) & (j < kw)
    g = w_hwio[:, jnp.clip(j, 0, kw - 1), :, :]                       # (KH,W_in,W_out,Cin,Cout)
    g = jnp.where(valid[None, :, :, None, None], g, 0.0)
    t = jnp.transpose(g, (0, 1, 3, 2, 4))                             # (KH,W_in,Cin,W_out,Cout)
    return t.reshape(kh, in_w * cin, w_out * cout)


def prepare_params(params, in_w):
    """Re-layout PyTorch-style params into the kernel layout (call once)."""
    _, cin1, kh1, kw1 = params["conv1_w"].shape
    _, _, kh2, kw2 = params["conv2_w"].shape
    wo1 = in_w - kw1 + 1
    wo2 = wo1 - kw2 + 1
    w1t = _toeplitz_weight(params["conv1_w"], in_w)          # (KH1, W*C0, Wo1*C1)
    return {
        # conv1 weights folded over KH so conv1 is a single GEMM: (KH1*W*C0, Wo1*C1)
        "w1flat": w1t.reshape(kh1 * in_w * cin1, w1t.shape[2]),
        # conv2 band weights kept per kernel row: (KH2, Wo1*C1, Wo2*C2)
        "w2t": _toeplitz_weight(params["conv2_w"], wo1),
        "b1r": jnp.tile(params["conv1_b"].astype(jnp.float32), wo1)[None, :],
        "b2r": jnp.tile(params["conv2_b"].astype(jnp.float32), wo2)[None, :],
    }


# --------------------------------------------------------------------------- #
# Forward wrapper (NCHW in / NCHW out, everything else inside one kernel).
# --------------------------------------------------------------------------- #
def toy_backbone_forward(x_nchw, prep):
    n, c0, h, w = x_nchw.shape
    kh2 = prep["w2t"].shape[0]
    kh1 = prep["w1flat"].shape[0] // (w * c0)          # square 5x5 kernels
    ho1, wo1 = h - kh1 + 1, w - kh1 + 1
    ho2, wo2 = ho1 - kh2 + 1, wo1 - kh2 + 1
    c1 = prep["b1r"].shape[1] // wo1
    c2 = prep["b2r"].shape[1] // wo2
    assert prep["w1flat"].shape == (kh1 * w * c0, wo1 * c1), \
        "params prepared for a different input width"

    # NCHW -> channel-minor rows -> KH-only (row) im2col band.  Cheap layout glue
    # on a 6 KiB input; replicates rows KH1x (~30 KiB), not a full 25x im2col.
    x_rows = jnp.transpose(x_nchw, (0, 2, 3, 1)).reshape(n, h, w * c0)
    x_band = jnp.concatenate(
        [x_rows[:, k:k + ho1, :] for k in range(kh1)], axis=-1)   # (N, Ho1, KH1*W*C0)
    x_band = x_band.reshape(n * ho1, kh1 * w * c0)                # (N*Ho1, 240)

    kernel = functools.partial(_fused_backbone_kernel,
                               n_imgs=n, ho1=ho1, ho2=ho2)
    out = pl.pallas_call(
        kernel,
        out_shape=jax.ShapeDtypeStruct((n * ho2, wo2 * c2), jnp.float32),
        in_specs=[
            pl.BlockSpec(memory_space=pltpu.MemorySpace.VMEM),    # x_band  (~23 KiB)
            pl.BlockSpec(memory_space=pltpu.MemorySpace.VMEM),    # w1flat  (~230 KiB)
            pl.BlockSpec(memory_space=pltpu.MemorySpace.VMEM),    # b1r
            pl.BlockSpec(memory_space=pl.ANY),                    # w2t stays in HBM
            pl.BlockSpec(memory_space=pltpu.MemorySpace.VMEM),    # b2r
        ],
        out_specs=pl.BlockSpec(memory_space=pltpu.MemorySpace.VMEM),
        scratch_shapes=[
            pltpu.VMEM(prep["w2t"].shape, jnp.float32),           # w2 landing buffer
            pltpu.SemaphoreType.DMA,                              # its completion sem
        ],
    )(x_band, prep["w1flat"], prep["b1r"], prep["w2t"], prep["b2r"])

    # (N*Ho2, Wo2*C2) -> NCHW
    return jnp.transpose(out.reshape(n, ho2, wo2, c2), (0, 3, 1, 2))


# --------------------------------------------------------------------------- #
# Deterministic synthetic params + pure-JAX reference for the self-check.
# --------------------------------------------------------------------------- #
def init_params(key):
    k1, k2, k3, k4 = jax.random.split(key, 4)

    def uinit(k, shape, fan_in):
        bound = 1.0 / jnp.sqrt(jnp.float32(fan_in))
        return jax.random.uniform(k, shape, jnp.float32, -bound, bound)

    return {
        "conv1_w": uinit(k1, (20, 3, 5, 5), 3 * 5 * 5),
        "conv1_b": uinit(k2, (20,), 3 * 5 * 5),
        "conv2_w": uinit(k3, (20, 20, 5, 5), 20 * 5 * 5),
        "conv2_b": uinit(k4, (20,), 20 * 5 * 5),
    }


def _reference_forward(x, params):
    def conv(x, w, b):
        y = jax.lax.conv_general_dilated(
            x, w, window_strides=(1, 1), padding="VALID",
            dimension_numbers=("NCHW", "OIHW", "NCHW"),
            precision=jax.lax.Precision.HIGHEST)
        return jax.nn.relu(y + b[None, :, None, None])

    return conv(conv(x, params["conv1_w"], params["conv1_b"]),
                params["conv2_w"], params["conv2_b"])


if __name__ == "__main__":
    key = jax.random.PRNGKey(0)
    pkey, xkey = jax.random.split(key)
    params = init_params(pkey)

    # PyTorch-style NCHW input: batch=2, 3 channels, 16x16 spatial.
    x = jax.random.normal(xkey, (2, 3, 16, 16), jnp.float32)

    prep = prepare_params(params, in_w=x.shape[3])       # one-time weight re-layout
    fwd = jax.jit(toy_backbone_forward)

    out = jax.block_until_ready(fwd(x, prep))
    assert out.shape == (2, 20, 8, 8), out.shape

    ref = jax.block_until_ready(_reference_forward(x, params))
    assert jnp.allclose(out, ref, atol=1e-4, rtol=1e-4), \
        float(jnp.max(jnp.abs(out - ref)))

    print("KERNEL_OK")
</pallas_src>

<mosaic_0001>
module attributes {stable_mosaic.version = 11 : i64} {
  func.func @_fused_backbone_kernel(%arg0: memref<24x240xf32, #tpu.memory_space<vmem>>, %arg1: memref<240x240xf32, #tpu.memory_space<vmem>>, %arg2: memref<1x240xf32, #tpu.memory_space<vmem>>, %arg3: memref<5x240x160xf32, #tpu.memory_space<any>>, %arg4: memref<1x160xf32, #tpu.memory_space<vmem>>, %arg5: memref<16x160xf32, #tpu.memory_space<vmem>>, %arg6: memref<5x240x160xf32, #tpu.memory_space<vmem>>, %arg7: memref<!tpu.dma_semaphore, #tpu.memory_space<semaphore_mem>>) attributes {dimension_semantics = [], scalar_prefetch = 0 : i64, scratch_operands = 2 : i64, tpu.core_type = #tpu.core_type<tc>} {
    tpu.enqueue_dma source(%arg3 : memref<5x240x160xf32, #tpu.memory_space<any>>) target(%arg6 : memref<5x240x160xf32, #tpu.memory_space<vmem>>) target_semaphore(%arg7 : memref<!tpu.dma_semaphore, #tpu.memory_space<semaphore_mem>>)
    %c0 = arith.constant 0 : index
    %c0_0 = arith.constant 0 : index
    %0 = vector.load %arg0[%c0, %c0_0] : memref<24x240xf32, #tpu.memory_space<vmem>>, vector<24x240xf32>
    %c0_1 = arith.constant 0 : index
    %c0_2 = arith.constant 0 : index
    %1 = vector.load %arg1[%c0_1, %c0_2] : memref<240x240xf32, #tpu.memory_space<vmem>>, vector<240x240xf32>
    %cst = arith.constant dense<0.000000e+00> : vector<24x240xf32>
    %2 = tpu.matmul %0, %1, %cst {dimension_numbers = #tpu.dot_dimension_numbers<[1], [0], [0], [1], [0, 0, 1, 1], [], []>} : vector<24x240xf32>, vector<240x240xf32>, vector<24x240xf32> -> vector<24x240xf32>
    %c0_3 = arith.constant 0 : index
    %c0_4 = arith.constant 0 : index
    %3 = vector.load %arg2[%c0_3, %c0_4] : memref<1x240xf32, #tpu.memory_space<vmem>>, vector<1x240xf32>
    %4 = vector.broadcast %3 : vector<1x240xf32> to vector<24x240xf32>
    %5 = arith.addf %2, %4 : vector<24x240xf32>
    %cst_5 = arith.constant 0.000000e+00 : f32
    %6 = vector.broadcast %cst_5 : f32 to vector<24x240xf32>
    %7 = arith.maximumf %5, %6 : vector<24x240xf32>
    tpu.wait_dma2 semaphore(%arg7 : memref<!tpu.dma_semaphore, #tpu.memory_space<semaphore_mem>>) src(%arg3 : memref<5x240x160xf32, #tpu.memory_space<any>>) dst(%arg6 : memref<5x240x160xf32, #tpu.memory_space<vmem>>)
    %8 = vector.extract_strided_slice %7 {offsets = [0, 0], sizes = [8, 240], strides = [1, 1]} : vector<24x240xf32> to vector<8x240xf32>
    %9 = vector.extract_strided_slice %7 {offsets = [12, 0], sizes = [8, 240], strides = [1, 1]} : vector<24x240xf32> to vector<8x240xf32>
    %10 = tpu.concatenate %8, %9 in 0 : vector<8x240xf32>, vector<8x240xf32> -> vector<16x240xf32>
    %c0_6 = arith.constant 0 : index
    %c0_7 = arith.constant 0 : index
    %c0_8 = arith.constant 0 : index
    %11 = vector.load %arg6[%c0_6, %c0_7, %c0_8] : memref<5x240x160xf32, #tpu.memory_space<vmem>>, vector<1x240x160xf32>
    %12 = vector.shape_cast %11 : vector<1x240x160xf32> to vector<240x160xf32>
    %cst_9 = arith.constant dense<0.000000e+00> : vector<16x160xf32>
    %13 = tpu.matmul %10, %12, %cst_9 {dimension_numbers = #tpu.dot_dimension_numbers<[1], [0], [0], [1], [0, 0, 1, 1], [], []>} : vector<16x240xf32>, vector<240x160xf32>, vector<16x160xf32> -> vector<16x160xf32>
    %14 = vector.extract_strided_slice %7 {offsets = [1, 0], sizes = [8, 240], strides = [1, 1]} : vector<24x240xf32> to vector<8x240xf32>
    %15 = vector.extract_strided_slice %7 {offsets = [13, 0], sizes = [8, 240], strides = [1, 1]} : vector<24x240xf32> to vector<8x240xf32>
    %16 = tpu.concatenate %14, %15 in 0 : vector<8x240xf32>, vector<8x240xf32> -> vector<16x240xf32>
    %c1 = arith.constant 1 : index
    %c0_10 = arith.constant 0 : index
    %c0_11 = arith.constant 0 : index
    %17 = vector.load %arg6[%c1, %c0_10, %c0_11] : memref<5x240x160xf32, #tpu.memory_space<vmem>>, vector<1x240x160xf32>
    %18 = vector.shape_cast %17 : vector<1x240x160xf32> to vector<240x160xf32>
    %cst_12 = arith.constant dense<0.000000e+00> : vector<16x160xf32>
    %19 = tpu.matmul %16, %18, %cst_12 {dimension_numbers = #tpu.dot_dimension_numbers<[1], [0], [0], [1], [0, 0, 1, 1], [], []>} : vector<16x240xf32>, vector<240x160xf32>, vector<16x160xf32> -> vector<16x160xf32>
    %20 = arith.addf %13, %19 : vector<16x160xf32>
    %21 = vector.extract_strided_slice %7 {offsets = [2, 0], sizes = [8, 240], strides = [1, 1]} : vector<24x240xf32> to vector<8x240xf32>
    %22 = vector.extract_strided_slice %7 {offsets = [14, 0], sizes = [8, 240], strides = [1, 1]} : vector<24x240xf32> to vector<8x240xf32>
    %23 = tpu.concatenate %21, %22 in 0 : vector<8x240xf32>, vector<8x240xf32> -> vector<16x240xf32>
    %c2 = arith.constant 2 : index
    %c0_13 = arith.constant 0 : index
    %c0_14 = arith.constant 0 : index
    %24 = vector.load %arg6[%c2, %c0_13, %c0_14] : memref<5x240x160xf32, #tpu.memory_space<vmem>>, vector<1x240x160xf32>
    %25 = vector.shape_cast %24 : vector<1x240x160xf32> to vector<240x160xf32>
    %cst_15 = arith.constant dense<0.000000e+00> : vector<16x160xf32>
    %26 = tpu.matmul %23, %25, %cst_15 {dimension_numbers = #tpu.dot_dimension_numbers<[1], [0], [0], [1], [0, 0, 1, 1], [], []>} : vector<16x240xf32>, vector<240x160xf32>, vector<16x160xf32> -> vector<16x160xf32>
    %27 = arith.addf %20, %26 : vector<16x160xf32>
    %28 = vector.extract_strided_slice %7 {offsets = [3, 0], sizes = [8, 240], strides = [1, 1]} : vector<24x240xf32> to vector<8x240xf32>
    %29 = vector.extract_strided_slice %7 {offsets = [15, 0], sizes = [8, 240], strides = [1, 1]} : vector<24x240xf32> to vector<8x240xf32>
    %30 = tpu.concatenate %28, %29 in 0 : vector<8x240xf32>, vector<8x240xf32> -> vector<16x240xf32>
    %c3 = arith.constant 3 : index
    %c0_16 = arith.constant 0 : index
    %c0_17 = arith.constant 0 : index
    %31 = vector.load %arg6[%c3, %c0_16, %c0_17] : memref<5x240x160xf32, #tpu.memory_space<vmem>>, vector<1x240x160xf32>
    %32 = vector.shape_cast %31 : vector<1x240x160xf32> to vector<240x160xf32>
    %cst_18 = arith.constant dense<0.000000e+00> : vector<16x160xf32>
    %33 = tpu.matmul %30, %32, %cst_18 {dimension_numbers = #tpu.dot_dimension_numbers<[1], [0], [0], [1], [0, 0, 1, 1], [], []>} : vector<16x240xf32>, vector<240x160xf32>, vector<16x160xf32> -> vector<16x160xf32>
    %34 = arith.addf %27, %33 : vector<16x160xf32>
    %35 = vector.extract_strided_slice %7 {offsets = [4, 0], sizes = [8, 240], strides = [1, 1]} : vector<24x240xf32> to vector<8x240xf32>
    %36 = vector.extract_strided_slice %7 {offsets = [16, 0], sizes = [8, 240], strides = [1, 1]} : vector<24x240xf32> to vector<8x240xf32>
    %37 = tpu.concatenate %35, %36 in 0 : vector<8x240xf32>, vector<8x240xf32> -> vector<16x240xf32>
    %c4 = arith.constant 4 : index
    %c0_19 = arith.constant 0 : index
    %c0_20 = arith.constant 0 : index
    %38 = vector.load %arg6[%c4, %c0_19, %c0_20] : memref<5x240x160xf32, #tpu.memory_space<vmem>>, vector<1x240x160xf32>
    %39 = vector.shape_cast %38 : vector<1x240x160xf32> to vector<240x160xf32>
    %cst_21 = arith.constant dense<0.000000e+00> : vector<16x160xf32>
    %40 = tpu.matmul %37, %39, %cst_21 {dimension_numbers = #tpu.dot_dimension_numbers<[1], [0], [0], [1], [0, 0, 1, 1], [], []>} : vector<16x240xf32>, vector<240x160xf32>, vector<16x160xf32> -> vector<16x160xf32>
    %41 = arith.addf %34, %40 : vector<16x160xf32>
    %c0_22 = arith.constant 0 : index
    %c0_23 = arith.constant 0 : index
    %42 = vector.load %arg4[%c0_22, %c0_23] : memref<1x160xf32, #tpu.memory_space<vmem>>, vector<1x160xf32>
    %43 = vector.broadcast %42 : vector<1x160xf32> to vector<16x160xf32>
    %44 = arith.addf %41, %43 : vector<16x160xf32>
    %cst_24 = arith.constant 0.000000e+00 : f32
    %45 = vector.broadcast %cst_24 : f32 to vector<16x160xf32>
    %46 = arith.maximumf %44, %45 : vector<16x160xf32>
    %c0_25 = arith.constant 0 : index
    %c0_26 = arith.constant 0 : index
    %47 = vector.load %arg5[%c0_25, %c0_26] : memref<16x160xf32, #tpu.memory_space<vmem>>, vector<16x160xf32>
    tpu.vector_store %arg5[%c0_25, %c0_26], %46 {strides = array<i32>} : memref<16x160xf32, #tpu.memory_space<vmem>>, vector<16x160xf32>,
    return
  }
}

</mosaic_0001>

<bundles_post_ra>
// kernel: toy_backbone_forward.1
= control target key start
LH: loop header
LB: loop body
LE: loop exit
PB: predicated region body
PF: predicated region fallthrough
CT: control target
= control target key end

     0   :  { %s3904_s0 = inlined_call_operand.vmem [shape: f32[24,240], index: 0, kind: input, shape index: {}]   ;;  %s3905_s1 = inlined_call_operand.vmem [shape: f32[240,240], index: 1, kind: input, shape index: {}]   ;;  %s3906_s2 = inlined_call_operand.vmem [shape: f32[1,240], index: 2, kind: input, shape index: {}]   ;;  %s3907_s3 = inlined_call_operand.vmem [shape: f32[5,240,160], index: 3, kind: input, shape index: {}]   ;;  %s3908_s4 = inlined_call_operand.vmem [shape: f32[1,160], index: 4, kind: input, shape index: {}]   ;;  %s3909_s5 = inlined_call_operand.vmem [shape: f32[16,160], index: 5, kind: output, shape index: {}]  }
   0x1   :  { %v1789_v0 = vld [vmem:[%s3907_s3] sm:$0xff]  ;;  %v1794_v1 = vld [vmem:[%s3907_s3 + $0x8] sm:$0xff]  ;;  %v1799_v2 = vld [vmem:[%s3907_s3 + $0x10] sm:$0xff] }
   0x2   :  { %3911 = vst [vmem:[#allocation6_spill] sm:$0xff] %v1789_v0  ;;  %v1804_v3 = vld [vmem:[%s3907_s3 + $0x18] sm:$0xff]  ;;  %v1809_v4 = vld [vmem:[%s3907_s3 + $0x20] sm:$0xff]  ;;  %v1814_v5 = vld [vmem:[%s3907_s3 + $0x28] sm:$0xff] }
   0x3   :  { %3912 = vst [vmem:[#allocation7_spill] sm:$0xff] %v1794_v1  ;;  %v1819_v6 = vld [vmem:[%s3907_s3 + $0x30] sm:$0xff]  ;;  %v1824_v7 = vld [vmem:[%s3907_s3 + $0x38] sm:$0xff]  ;;  %v1829_v8 = vld [vmem:[%s3907_s3 + $0x40] sm:$0xff] }
   0x4   :  { %3913 = vst [vmem:[#allocation8_spill] sm:$0xff] %v1799_v2  ;;  %v1834_v9 = vld [vmem:[%s3907_s3 + $0x48] sm:$0xff]  ;;  %v1839_v10 = vld [vmem:[%s3907_s3 + $0x50] sm:$0xff]  ;;  %v1844_v11 = vld [vmem:[%s3907_s3 + $0x58] sm:$0xff] }
   0x5   :  { %3914 = vst [vmem:[#allocation9_spill] sm:$0xff] %v1804_v3  ;;  %v1849_v12 = vld [vmem:[%s3907_s3 + $0x60] sm:$0xff]  ;;  %v1854_v13 = vld [vmem:[%s3907_s3 + $0x68] sm:$0xff]  ;;  %v1859_v14 = vld [vmem:[%s3907_s3 + $0x70] sm:$0xff] }
   0x6   :  { %3915 = vst [vmem:[#allocation10_spill] sm:$0xff] %v1809_v4  ;;  %v1864_v15 = vld [vmem:[%s3907_s3 + $0x78] sm:$0xff]  ;;  %v1869_v16 = vld [vmem:[%s3907_s3 + $0x80] sm:$0xff]  ;;  %v1874_v17 = vld [vmem:[%s3907_s3 + $0x88] sm:$0xff] }
   0x7   :  { %3916 = vst [vmem:[#allocation11_spill] sm:$0xff] %v1814_v5  ;;  %v1879_v18 = vld [vmem:[%s3907_s3 + $0x90] sm:$0xff]  ;;  %v1884_v19 = vld [vmem:[%s3907_s3 + $0x98] sm:$0xff]  ;;  %v1889_v20 = vld [vmem:[%s3907_s3 + $0xa0] sm:$0xff] }
   0x8   :  { %3917 = vst [vmem:[#allocation12_spill] sm:$0xff] %v1819_v6  ;;  %v1894_v21 = vld [vmem:[%s3907_s3 + $0xa8] sm:$0xff]  ;;  %v1899_v22 = vld [vmem:[%s3907_s3 + $0xb0] sm:$0xff]  ;;  %v1904_v23 = vld [vmem:[%s3907_s3 + $0xb8] sm:$0xff] }
   0x9   :  { %3918 = vst [vmem:[#allocation13_spill] sm:$0xff] %v1824_v7  ;;  %v1909_v24 = vld [vmem:[%s3907_s3 + $0xc0] sm:$0xff]  ;;  %v1914_v25 = vld [vmem:[%s3907_s3 + $0xc8] sm:$0xff]  ;;  %v1919_v26 = vld [vmem:[%s3907_s3 + $0xd0] sm:$0xff] }
   0xa   :  { %3919 = vst [vmem:[#allocation14_spill] sm:$0xff] %v1829_v8  ;;  %v1924_v27 = vld [vmem:[%s3907_s3 + $0xd8] sm:$0xff]  ;;  %v1929_v28 = vld [vmem:[%s3907_s3 + $0xe0] sm:$0xff]  ;;  %v1934_v29 = vld [vmem:[%s3907_s3 + $0xe8] sm:$0xff] }
   0xb   :  { %3920 = vst [vmem:[#allocation15_spill] sm:$0xff] %v1834_v9  ;;  %v1939_v30 = vld [vmem:[%s3907_s3 + $0xf0] sm:$0xff]  ;;  %v1944_v31 = vld [vmem:[%s3907_s3 + $0xf8] sm:$0xff]  ;;  %v1949_v32 = vld [vmem:[%s3907_s3 + $0x100] sm:$0xff] }
   0xc   :  { %3921 = vst [vmem:[#allocation16_spill] sm:$0xff] %v1839_v10  ;;  %v1954_v33 = vld [vmem:[%s3907_s3 + $0x108] sm:$0xff]  ;;  %v1959_v34 = vld [vmem:[%s3907_s3 + $0x110] sm:$0xff]  ;;  %v1964_v35 = vld [vmem:[%s3907_s3 + $0x118] sm:$0xff] }
   0xd   :  { %3922 = vst [vmem:[#allocation17_spill] sm:$0xff] %v1844_v11  ;;  %v1969_v36 = vld [vmem:[%s3907_s3 + $0x120] sm:$0xff]  ;;  %v1974_v37 = vld [vmem:[%s3907_s3 + $0x128] sm:$0xff]  ;;  %v1979_v38 = vld [vmem:[%s3907_s3 + $0x130] sm:$0xff] }
   0xe   :  { %3923 = vst [vmem:[#allocation18_spill] sm:$0xff] %v1849_v12  ;;  %v1984_v39 = vld [vmem:[%s3907_s3 + $0x138] sm:$0xff]  ;;  %v1989_v40 = vld [vmem:[%s3907_s3 + $0x140] sm:$0xff]  ;;  %v1994_v41 = vld [vmem:[%s3907_s3 + $0x148] sm:$0xff] }
   0xf   :  { %3924 = vst [vmem:[#allocation19_spill] sm:$0xff] %v1854_v13  ;;  %v1999_v42 = vld [vmem:[%s3907_s3 + $0x150] sm:$0xff]  ;;  %v2004_v43 = vld [vmem:[%s3907_s3 + $0x158] sm:$0xff]  ;;  %v2009_v44 = vld [vmem:[%s3907_s3 + $0x160] sm:$0xff] }
  0x10   :  { %3925 = vst [vmem:[#allocation20_spill] sm:$0xff] %v1859_v14  ;;  %v2014_v45 = vld [vmem:[%s3907_s3 + $0x168] sm:$0xff]  ;;  %v2019_v46 = vld [vmem:[%s3907_s3 + $0x170] sm:$0xff]  ;;  %v2024_v47 = vld [vmem:[%s3907_s3 + $0x178] sm:$0xff] }
  0x11   :  { %3926 = vst [vmem:[#allocation21_spill] sm:$0xff] %v1864_v15  ;;  %v2029_v48 = vld [vmem:[%s3907_s3 + $0x180] sm:$0xff]  ;;  %v2034_v49 = vld [vmem:[%s3907_s3 + $0x188] sm:$0xff]  ;;  %v2039_v50 = vld [vmem:[%s3907_s3 + $0x190] sm:$0xff] }
  0x12   :  { %3927 = vst [vmem:[#allocation22_spill] sm:$0xff] %v1869_v16  ;;  %v2044_v51 = vld [vmem:[%s3907_s3 + $0x198] sm:$0xff]  ;;  %v2049_v52 = vld [vmem:[%s3907_s3 + $0x1a0] sm:$0xff]  ;;  %v2054_v53 = vld [vmem:[%s3907_s3 + $0x1a8] sm:$0xff] }
  0x13   :  { %3928 = vst [vmem:[#allocation23_spill] sm:$0xff] %v1874_v17  ;;  %v2059_v54 = vld [vmem:[%s3907_s3 + $0x1b0] sm:$0xff]  ;;  %v2064_v55 = vld [vmem:[%s3907_s3 + $0x1b8] sm:$0xff]  ;;  %v2069_v56 = vld [vmem:[%s3907_s3 + $0x1c0] sm:$0xff] }
  0x14   :  { %3929 = vst [vmem:[#allocation24_spill] sm:$0xff] %v1879_v18  ;;  %v2074_v57 = vld [vmem:[%s3907_s3 + $0x1c8] sm:$0xff]  ;;  %v2079_v58 = vld [vmem:[%s3907_s3 + $0x1d0] sm:$0xff]  ;;  %v2084_v59 = vld [vmem:[%s3907_s3 + $0x1d8] sm:$0xff] }
  0x15   :  { %3930 = vst [vmem:[#allocation25_spill] sm:$0xff] %v1884_v19  ;;  %v2089_v60 = vld [vmem:[%s3907_s3 + $0x1e0] sm:$0xff]  ;;  %v2094_v61 = vld [vmem:[%s3907_s3 + $0x1e8] sm:$0xff]  ;;  %v2099_v62 = vld [vmem:[%s3907_s3 + $0x1f0] sm:$0xff] }
  0x16   :  { %3931 = vst [vmem:[#allocation26_spill] sm:$0xff] %v1889_v20  ;;  %v2104_v63 = vld [vmem:[%s3907_s3 + $0x1f8] sm:$0xff]  ;;  %v2134_v0 = vld [vmem:[%s3907_s3 + $0x228] sm:$0xff] }
  0x17   :  { %3932 = vst [vmem:[#allocation27_spill] sm:$0xff] %v1894_v21  ;;  %v2124_v1 = vld [vmem:[%s3907_s3 + $0x218] sm:$0xff]  ;;  %v2154_v2 = vld [vmem:[%s3907_s3 + $0x248] sm:$0xff] }
  0x18   :  { %3933 = vst [vmem:[#allocation28_spill] sm:$0xff] %v1899_v22  ;;  %v2144_v3 = vld [vmem:[%s3907_s3 + $0x238] sm:$0xff]  ;;  %v2174_v4 = vld [vmem:[%s3907_s3 + $0x268] sm:$0xff] }
  0x19   :  { %3934 = vst [vmem:[#allocation29_spill] sm:$0xff] %v1904_v23  ;;  %v2164_v5 = vld [vmem:[%s3907_s3 + $0x258] sm:$0xff]  ;;  %v2194_v6 = vld [vmem:[%s3907_s3 + $0x288] sm:$0xff] }
  0x1a   :  { %3935 = vst [vmem:[#allocation30_spill] sm:$0xff] %v1909_v24  ;;  %v2184_v7 = vld [vmem:[%s3907_s3 + $0x278] sm:$0xff]  ;;  %v2214_v8 = vld [vmem:[%s3907_s3 + $0x2a8] sm:$0xff] }
  0x1b   :  { %3936 = vst [vmem:[#allocation31_spill] sm:$0xff] %v1914_v25  ;;  %v2204_v9 = vld [vmem:[%s3907_s3 + $0x298] sm:$0xff]  ;;  %v2234_v10 = vld [vmem:[%s3907_s3 + $0x2c8] sm:$0xff] }
  0x1c   :  { %3937 = vst [vmem:[#allocation32_spill] sm:$0xff] %v1919_v26  ;;  %v2224_v11 = vld [vmem:[%s3907_s3 + $0x2b8] sm:$0xff]  ;;  %v2254_v12 = vld [vmem:[%s3907_s3 + $0x2e8] sm:$0xff] }
  0x1d   :  { %3938 = vst [vmem:[#allocation33_spill] sm:$0xff] %v1924_v27  ;;  %v2244_v13 = vld [vmem:[%s3907_s3 + $0x2d8] sm:$0xff]  ;;  %v2274_v14 = vld [vmem:[%s3907_s3 + $0x308] sm:$0xff]  ;;  %v2389_v27 = vld [vmem:[%s3907_s3 + $0x3c0] sm:$0xff] }
  0x1e   :  { %3939 = vst [vmem:[#allocation34_spill] sm:$0xff] %v1929_v28  ;;  %v2264_v15 = vld [vmem:[%s3907_s3 + $0x2f8] sm:$0xff]  ;;  %v2294_v16 = vld [vmem:[%s3907_s3 + $0x328] sm:$0xff] }
  0x1f   :  { %3940 = vst [vmem:[#allocation35_spill] sm:$0xff] %v1934_v29  ;;  %v2284_v17 = vld [vmem:[%s3907_s3 + $0x318] sm:$0xff]  ;;  %v2314_v18 = vld [vmem:[%s3907_s3 + $0x348] sm:$0xff]  ;;  %v2409_v29 = vld [vmem:[%s3907_s3 + $0x3e0] sm:$0xff] }
  0x20   :  { %3941 = vst [vmem:[#allocation36_spill] sm:$0xff] %v1939_v30  ;;  %v2304_v19 = vld [vmem:[%s3907_s3 + $0x338] sm:$0xff]  ;;  %v2334_v20 = vld [vmem:[%s3907_s3 + $0x368] sm:$0xff] }
  0x21   :  { %3942 = vst [vmem:[#allocation37_spill] sm:$0xff] %v1944_v31  ;;  %v2324_v21 = vld [vmem:[%s3907_s3 + $0x358] sm:$0xff]  ;;  %v2354_v22 = vld [vmem:[%s3907_s3 + $0x388] sm:$0xff] }
  0x22   :  { %3943 = vst [vmem:[#allocation38_spill] sm:$0xff] %v1949_v32  ;;  %v2114_v32 = vld [vmem:[%s3907_s3 + $0x208] sm:$0xff]  ;;  %v2344_v23 = vld [vmem:[%s3907_s3 + $0x378] sm:$0xff] }
  0x23   :  { %3944 = vst [vmem:[#allocation39_spill] sm:$0xff] %v1954_v33  ;;  %v2109_v33 = vld [vmem:[%s3907_s3 + $0x200] sm:$0xff]  ;;  %v2364_v25 = vld [vmem:[%s3907_s3 + $0x398] sm:$0xff]  ;;  %v2374_v24 = vld [vmem:[%s3907_s3 + $0x3a8] sm:$0xff] }
  0x24   :  { %3945 = vst [vmem:[#allocation40_spill] sm:$0xff] %v1959_v34  ;;  %v2129_v34 = vld [vmem:[%s3907_s3 + $0x220] sm:$0xff]  ;;  %v2394_v26 = vld [vmem:[%s3907_s3 + $0x3c8] sm:$0xff] }
  0x25   :  { %3946 = vst [vmem:[#allocation41_spill] sm:$0xff] %v1964_v35  ;;  %v2119_v35 = vld [vmem:[%s3907_s3 + $0x210] sm:$0xff] }
  0x26   :  { %3947 = vst [vmem:[#allocation42_spill] sm:$0xff] %v1969_v36  ;;  %v2149_v36 = vld [vmem:[%s3907_s3 + $0x240] sm:$0xff] }
  0x27   :  { %3948 = vst [vmem:[#allocation43_spill] sm:$0xff] %v1974_v37  ;;  %v2139_v37 = vld [vmem:[%s3907_s3 + $0x230] sm:$0xff] }
  0x28   :  { %3949 = vst [vmem:[#allocation44_spill] sm:$0xff] %v1979_v38  ;;  %v2169_v38 = vld [vmem:[%s3907_s3 + $0x260] sm:$0xff] }
  0x29   :  { %3950 = vst [vmem:[#allocation45_spill] sm:$0xff] %v1984_v39  ;;  %v2159_v39 = vld [vmem:[%s3907_s3 + $0x250] sm:$0xff] }
  0x2a   :  { %3951 = vst [vmem:[#allocation46_spill] sm:$0xff] %v1989_v40  ;;  %v2189_v40 = vld [vmem:[%s3907_s3 + $0x280] sm:$0xff] }
  0x2b   :  { %3952 = vst [vmem:[#allocation47_spill] sm:$0xff] %v1994_v41  ;;  %v2179_v41 = vld [vmem:[%s3907_s3 + $0x270] sm:$0xff] }
  0x2c   :  { %3953 = vst [vmem:[#allocation48_spill] sm:$0xff] %v1999_v42  ;;  %v2209_v42 = vld [vmem:[%s3907_s3 + $0x2a0] sm:$0xff] }
  0x2d   :  { %3954 = vst [vmem:[#allocation49_spill] sm:$0xff] %v2004_v43  ;;  %v2199_v43 = vld [vmem:[%s3907_s3 + $0x290] sm:$0xff] }
  0x2e   :  { %3955 = vst [vmem:[#allocation50_spill] sm:$0xff] %v2009_v44  ;;  %v2229_v44 = vld [vmem:[%s3907_s3 + $0x2c0] sm:$0xff] }
  0x2f   :  { %3956 = vst [vmem:[#allocation51_spill] sm:$0xff] %v2014_v45  ;;  %v2219_v45 = vld [vmem:[%s3907_s3 + $0x2b0] sm:$0xff] }
  0x30   :  { %3957 = vst [vmem:[#allocation52_spill] sm:$0xff] %v2019_v46  ;;  %v2249_v46 = vld [vmem:[%s3907_s3 + $0x2e0] sm:$0xff] }
  0x31   :  { %3958 = vst [vmem:[#allocation53_spill] sm:$0xff] %v2024_v47  ;;  %v2239_v47 = vld [vmem:[%s3907_s3 + $0x2d0] sm:$0xff] }
  0x32   :  { %3959 = vst [vmem:[#allocation54_spill] sm:$0xff] %v2029_v48  ;;  %v2269_v48 = vld [vmem:[%s3907_s3 + $0x300] sm:$0xff] }
  0x33   :  { %3960 = vst [vmem:[#allocation55_spill] sm:$0xff] %v2034_v49  ;;  %v2259_v49 = vld [vmem:[%s3907_s3 + $0x2f0] sm:$0xff] }
  0x34   :  { %3961 = vst [vmem:[#allocation56_spill] sm:$0xff] %v2039_v50  ;;  %v2289_v50 = vld [vmem:[%s3907_s3 + $0x320] sm:$0xff] }
  0x35   :  { %3962 = vst [vmem:[#allocation57_spill] sm:$0xff] %v2044_v51  ;;  %v2279_v51 = vld [vmem:[%s3907_s3 + $0x310] sm:$0xff] }
  0x36   :  { %3963 = vst [vmem:[#allocation58_spill] sm:$0xff] %v2049_v52  ;;  %v2309_v52 = vld [vmem:[%s3907_s3 + $0x340] sm:$0xff] }
  0x37   :  { %3964 = vst [vmem:[#allocation59_spill] sm:$0xff] %v2054_v53  ;;  %v2299_v53 = vld [vmem:[%s3907_s3 + $0x330] sm:$0xff] }
  0x38   :  { %3965 = vst [vmem:[#allocation60_spill] sm:$0xff] %v2059_v54  ;;  %v2329_v54 = vld [vmem:[%s3907_s3 + $0x360] sm:$0xff] }
  0x39   :  { %3966 = vst [vmem:[#allocation61_spill] sm:$0xff] %v2064_v55  ;;  %v2319_v55 = vld [vmem:[%s3907_s3 + $0x350] sm:$0xff] }
  0x3a   :  { %3967 = vst [vmem:[#allocation62_spill] sm:$0xff] %v2069_v56  ;;  %v2349_v56 = vld [vmem:[%s3907_s3 + $0x380] sm:$0xff] }
  0x3b   :  { %3968 = vst [vmem:[#allocation63_spill] sm:$0xff] %v2074_v57  ;;  %v2339_v57 = vld [vmem:[%s3907_s3 + $0x370] sm:$0xff] }
  0x3c   :  { %3969 = vst [vmem:[#allocation64_spill] sm:$0xff] %v2079_v58  ;;  %v2369_v58 = vld [vmem:[%s3907_s3 + $0x3a0] sm:$0xff] }
  0x3d   :  { %3970 = vst [vmem:[#allocation65_spill] sm:$0xff] %v2084_v59  ;;  %v2359_v59 = vld [vmem:[%s3907_s3 + $0x390] sm:$0xff] }
  0x3e   :  { %3971 = vst [vmem:[#allocation66_spill] sm:$0xff] %v2089_v60  ;;  %v2384_v60 = vld [vmem:[%s3907_s3 + $0x3b8] sm:$0xff] }
  0x3f   :  { %3972 = vst [vmem:[#allocation67_spill] sm:$0xff] %v2094_v61  ;;  %v2379_v61 = vld [vmem:[%s3907_s3 + $0x3b0] sm:$0xff] }
  0x40   :  { %3973 = vst [vmem:[#allocation68_spill] sm:$0xff] %v2099_v62  ;;  %v2404_v62 = vld [vmem:[%s3907_s3 + $0x3d8] sm:$0xff] }
  0x41   :  { %3974 = vst [vmem:[#allocation69_spill] sm:$0xff] %v2104_v63  ;;  %v2399_v63 = vld [vmem:[%s3907_s3 + $0x3d0] sm:$0xff] }
  0x42   :  { %3975 = vst [vmem:[#allocation70_spill] sm:$0xff] %v2109_v33 }
  0x43   :  { %3976 = vst [vmem:[#allocation71_spill] sm:$0xff] %v2114_v32 }
  0x44   :  { %3977 = vst [vmem:[#allocation72_spill] sm:$0xff] %v2119_v35 }
  0x45   :  { %3978 = vst [vmem:[#allocation73_spill] sm:$0xff] %v2124_v1 }
  0x46   :  { %3979 = vst [vmem:[#allocation74_spill] sm:$0xff] %v2129_v34 }
  0x47   :  { %3980 = vst [vmem:[#allocation75_spill] sm:$0xff] %v2134_v0 }
  0x48   :  { %3981 = vst [vmem:[#allocation76_spill] sm:$0xff] %v2139_v37 }
  0x49   :  { %3982 = vst [vmem:[#allocation77_spill] sm:$0xff] %v2144_v3 }
  0x4a   :  { %3983 = vst [vmem:[#allocation78_spill] sm:$0xff] %v2249_v46 }
  0x4b   :  { %3984 = vst [vmem:[#allocation79_spill] sm:$0xff] %v2254_v12 }
  0x4c   :  { %3985 = vst [vmem:[#allocation80_spill] sm:$0xff] %v2259_v49 }
  0x4d   :  { %3986 = vst [vmem:[#allocation81_spill] sm:$0xff] %v2264_v15 }
  0x4e   :  { %3987 = vst [vmem:[#allocation82_spill] sm:$0xff] %v2269_v48 }
  0x4f   :  { %3988 = vst [vmem:[#allocation83_spill] sm:$0xff] %v2274_v14 }
  0x50   :  { %3989 = vst [vmem:[#allocation84_spill] sm:$0xff] %v2389_v27  ;;  %v2414_v27 = vld [vmem:[%s3907_s3 + $0x3e8] sm:$0xff] }
  0x51   :  { %3990 = vst [vmem:[#allocation85_spill] sm:$0xff] %v2394_v26  ;;  %v2419_v26 = vld [vmem:[%s3907_s3 + $0x3f0] sm:$0xff] }
  0x52   :  { %3991 = vst [vmem:[#allocation86_spill] sm:$0xff] %v2399_v63  ;;  %v2424_v63 = vld [vmem:[%s3907_s3 + $0x3f8] sm:$0xff] }
  0x53   :  { %3992 = vst [vmem:[#allocation87_spill] sm:$0xff] %v2404_v62  ;;  %v2429_v62 = vld [vmem:[%s3907_s3 + $0x400] sm:$0xff] }
  0x54   :  { %3993 = vst [vmem:[#allocation88_spill] sm:$0xff] %v2409_v29  ;;  %v2434_v29 = vld [vmem:[%s3907_s3 + $0x408] sm:$0xff] }
  0x55   :  { %3994 = vst [vmem:[#allocation89_spill] sm:$0xff] %v2414_v27  ;;  %v2439_v27 = vld [vmem:[%s3907_s3 + $0x410] sm:$0xff] }
  0x56   :  { %3995 = vst [vmem:[#allocation90_spill] sm:$0xff] %v2419_v26  ;;  %v2444_v26 = vld [vmem:[%s3907_s3 + $0x418] sm:$0xff] }
  0x57   :  { %3996 = vst [vmem:[#allocation91_spill] sm:$0xff] %v2424_v63  ;;  %v2449_v63 = vld [vmem:[%s3907_s3 + $0x420] sm:$0xff] }
  0x58   :  { %3997 = vst [vmem:[#allocation92_spill] sm:$0xff] %v2429_v62  ;;  %v2454_v62 = vld [vmem:[%s3907_s3 + $0x428] sm:$0xff] }
  0x59   :  { %3998 = vst [vmem:[#allocation93_spill] sm:$0xff] %v2434_v29  ;;  %v2459_v29 = vld [vmem:[%s3907_s3 + $0x430] sm:$0xff] }
  0x5a   :  { %3999 = vst [vmem:[#allocation94_spill] sm:$0xff] %v2439_v27  ;;  %v2464_v27 = vld [vmem:[%s3907_s3 + $0x438] sm:$0xff] }
  0x5b   :  { %4000 = vst [vmem:[#allocation95_spill] sm:$0xff] %v2444_v26  ;;  %v2469_v26 = vld [vmem:[%s3907_s3 + $0x440] sm:$0xff] }
  0x5c   :  { %4001 = vst [vmem:[#allocation96_spill] sm:$0xff] %v2449_v63  ;;  %v2474_v63 = vld [vmem:[%s3907_s3 + $0x448] sm:$0xff] }
  0x5d   :  { %4002 = vst [vmem:[#allocation97_spill] sm:$0xff] %v2454_v62  ;;  %v2479_v62 = vld [vmem:[%s3907_s3 + $0x450] sm:$0xff] }
  0x5e   :  { %4003 = vst [vmem:[#allocation98_spill] sm:$0xff] %v2459_v29  ;;  %v2484_v29 = vld [vmem:[%s3907_s3 + $0x458] sm:$0xff] }
  0x5f   :  { %4004 = vst [vmem:[#allocation99_spill] sm:$0xff] %v2464_v27  ;;  %v2489_v27 = vld [vmem:[%s3907_s3 + $0x460] sm:$0xff] }
  0x60   :  { %4005 = vst [vmem:[#allocation100_spill] sm:$0xff] %v2469_v26  ;;  %v2494_v26 = vld [vmem:[%s3907_s3 + $0x468] sm:$0xff] }
  0x61   :  { %4006 = vst [vmem:[#allocation101_spill] sm:$0xff] %v2474_v63  ;;  %v2499_v63 = vld [vmem:[%s3907_s3 + $0x470] sm:$0xff] }
  0x62   :  { %4007 = vst [vmem:[#allocation102_spill] sm:$0xff] %v2479_v62  ;;  %v2504_v62 = vld [vmem:[%s3907_s3 + $0x478] sm:$0xff] }
  0x63   :  { %4008 = vst [vmem:[#allocation103_spill] sm:$0xff] %v2484_v29  ;;  %v2509_v29 = vld [vmem:[%s3907_s3 + $0x480] sm:$0xff] }
  0x64   :  { %4009 = vst [vmem:[#allocation104_spill] sm:$0xff] %v2489_v27  ;;  %v2514_v27 = vld [vmem:[%s3907_s3 + $0x488] sm:$0xff] }
  0x65   :  { %4010 = vst [vmem:[#allocation105_spill] sm:$0xff] %v2494_v26  ;;  %v2519_v26 = vld [vmem:[%s3907_s3 + $0x490] sm:$0xff] }
  0x66   :  { %4011 = vst [vmem:[#allocation106_spill] sm:$0xff] %v2499_v63  ;;  %v2524_v63 = vld [vmem:[%s3907_s3 + $0x498] sm:$0xff] }
  0x67   :  { %4012 = vst [vmem:[#allocation107_spill] sm:$0xff] %v2504_v62  ;;  %v2529_v62 = vld [vmem:[%s3907_s3 + $0x4a0] sm:$0xff] }
  0x68   :  { %4013 = vst [vmem:[#allocation108_spill] sm:$0xff] %v2509_v29  ;;  %v2534_v29 = vld [vmem:[%s3907_s3 + $0x4a8] sm:$0xff] }
  0x69   :  { %4014 = vst [vmem:[#allocation109_spill] sm:$0xff] %v2514_v27  ;;  %v2539_v27 = vld [vmem:[%s3907_s3 + $0x4b0] sm:$0xff] }
  0x6a   :  { %4015 = vst [vmem:[#allocation110_spill] sm:$0xff] %v2519_v26  ;;  %v2544_v26 = vld [vmem:[%s3907_s3 + $0x4b8] sm:$0xff] }
  0x6b   :  { %4016 = vst [vmem:[#allocation111_spill] sm:$0xff] %v2524_v63  ;;  %v2549_v63 = vld [vmem:[%s3907_s3 + $0x4c0] sm:$0xff] }
  0x6c   :  { %4017 = vst [vmem:[#allocation112_spill] sm:$0xff] %v2529_v62  ;;  %v2554_v62 = vld [vmem:[%s3907_s3 + $0x4c8] sm:$0xff] }
  0x6d   :  { %4018 = vst [vmem:[#allocation113_spill] sm:$0xff] %v2534_v29  ;;  %v2559_v29 = vld [vmem:[%s3907_s3 + $0x4d0] sm:$0xff] }
  0x6e   :  { %4019 = vst [vmem:[#allocation114_spill] sm:$0xff] %v2539_v27  ;;  %v2564_v27 = vld [vmem:[%s3907_s3 + $0x4d8] sm:$0xff] }
  0x6f   :  { %4020 = vst [vmem:[#allocation115_spill] sm:$0xff] %v2544_v26  ;;  %v2569_v26 = vld [vmem:[%s3907_s3 + $0x4e0] sm:$0xff] }
  0x70   :  { %4021 = vst [vmem:[#allocation116_spill] sm:$0xff] %v2549_v63  ;;  %v2574_v63 = vld [vmem:[%s3907_s3 + $0x4e8] sm:$0xff] }
  0x71   :  { %4022 = vst [vmem:[#allocation117_spill] sm:$0xff] %v2554_v62  ;;  %v2579_v62 = vld [vmem:[%s3907_s3 + $0x4f0] sm:$0xff] }
  0x72   :  { %4023 = vst [vmem:[#allocation118_spill] sm:$0xff] %v2559_v29  ;;  %v2584_v29 = vld [vmem:[%s3907_s3 + $0x4f8] sm:$0xff] }
  0x73   :  { %4024 = vst [vmem:[#allocation119_spill] sm:$0xff] %v2564_v27  ;;  %v2589_v27 = vld [vmem:[%s3907_s3 + $0x500] sm:$0xff] }
  0x74   :  { %4025 = vst [vmem:[#allocation120_spill] sm:$0xff] %v2569_v26  ;;  %v2594_v26 = vld [vmem:[%s3907_s3 + $0x508] sm:$0xff] }
  0x75   :  { %4026 = vst [vmem:[#allocation121_spill] sm:$0xff] %v2574_v63  ;;  %v2599_v63 = vld [vmem:[%s3907_s3 + $0x510] sm:$0xff] }
  0x76   :  { %4027 = vst [vmem:[#allocation122_spill] sm:$0xff] %v2579_v62  ;;  %v2604_v62 = vld [vmem:[%s3907_s3 + $0x518] sm:$0xff] }
  0x77   :  { %4028 = vst [vmem:[#allocation123_spill] sm:$0xff] %v2584_v29  ;;  %v2609_v29 = vld [vmem:[%s3907_s3 + $0x520] sm:$0xff] }
  0x78   :  { %4029 = vst [vmem:[#allocation124_spill] sm:$0xff] %v2589_v27  ;;  %v2614_v27 = vld [vmem:[%s3907_s3 + $0x528] sm:$0xff] }
  0x79   :  { %4030 = vst [vmem:[#allocation125_spill] sm:$0xff] %v2594_v26  ;;  %v2619_v26 = vld [vmem:[%s3907_s3 + $0x530] sm:$0xff] }
  0x7a   :  { %4031 = vst [vmem:[#allocation126_spill] sm:$0xff] %v2599_v63  ;;  %v2624_v63 = vld [vmem:[%s3907_s3 + $0x538] sm:$0xff] }
  0x7b   :  { %4032 = vst [vmem:[#allocation127_spill] sm:$0xff] %v2604_v62  ;;  %v2629_v62 = vld [vmem:[%s3907_s3 + $0x540] sm:$0xff] }
  0x7c   :  { %4033 = vst [vmem:[#allocation128_spill] sm:$0xff] %v2609_v29  ;;  %v2634_v29 = vld [vmem:[%s3907_s3 + $0x548] sm:$0xff] }
  0x7d   :  { %4034 = vst [vmem:[#allocation129_spill] sm:$0xff] %v2614_v27  ;;  %v2639_v27 = vld [vmem:[%s3907_s3 + $0x550] sm:$0xff] }
  0x7e   :  { %4035 = vst [vmem:[#allocation130_spill] sm:$0xff] %v2619_v26  ;;  %v2644_v26 = vld [vmem:[%s3907_s3 + $0x558] sm:$0xff] }
  0x7f   :  { %4036 = vst [vmem:[#allocation131_spill] sm:$0xff] %v2624_v63  ;;  %v2649_v63 = vld [vmem:[%s3907_s3 + $0x560] sm:$0xff] }
  0x80   :  { %4037 = vst [vmem:[#allocation132_spill] sm:$0xff] %v2629_v62  ;;  %v2654_v62 = vld [vmem:[%s3907_s3 + $0x568] sm:$0xff] }
  0x81   :  { %4038 = vst [vmem:[#allocation133_spill] sm:$0xff] %v2634_v29  ;;  %v2659_v29 = vld [vmem:[%s3907_s3 + $0x570] sm:$0xff] }
  0x82   :  { %4039 = vst [vmem:[#allocation134_spill] sm:$0xff] %v2639_v27  ;;  %v2664_v27 = vld [vmem:[%s3907_s3 + $0x578] sm:$0xff] }
  0x83   :  { %4040 = vst [vmem:[#allocation135_spill] sm:$0xff] %v2644_v26  ;;  %v2669_v26 = vld [vmem:[%s3907_s3 + $0x580] sm:$0xff] }
  0x84   :  { %4041 = vst [vmem:[#allocation136_spill] sm:$0xff] %v2649_v63  ;;  %v2674_v63 = vld [vmem:[%s3907_s3 + $0x588] sm:$0xff] }
  0x85   :  { %4042 = vst [vmem:[#allocation137_spill] sm:$0xff] %v2654_v62  ;;  %v2679_v62 = vld [vmem:[%s3907_s3 + $0x590] sm:$0xff] }
  0x86   :  { %4043 = vst [vmem:[#allocation138_spill] sm:$0xff] %v2659_v29  ;;  %v2684_v29 = vld [vmem:[%s3907_s3 + $0x598] sm:$0xff] }
  0x87   :  { %4044 = vst [vmem:[#allocation139_spill] sm:$0xff] %v2664_v27  ;;  %v2689_v27 = vld [vmem:[%s3907_s3 + $0x5a0] sm:$0xff] }
  0x88   :  { %4045 = vst [vmem:[#allocation140_spill] sm:$0xff] %v2669_v26  ;;  %v2694_v26 = vld [vmem:[%s3907_s3 + $0x5a8] sm:$0xff] }
  0x89   :  { %4046 = vst [vmem:[#allocation141_spill] sm:$0xff] %v2674_v63  ;;  %v2699_v63 = vld [vmem:[%s3907_s3 + $0x5b0] sm:$0xff] }
  0x8a   :  { %4047 = vst [vmem:[#allocation142_spill] sm:$0xff] %v2679_v62  ;;  %v2704_v62 = vld [vmem:[%s3907_s3 + $0x5b8] sm:$0xff] }
  0x8b   :  { %4048 = vst [vmem:[#allocation143_spill] sm:$0xff] %v2684_v29  ;;  %v2709_v29 = vld [vmem:[%s3907_s3 + $0x5c0] sm:$0xff] }
  0x8c   :  { %4049 = vst [vmem:[#allocation144_spill] sm:$0xff] %v2689_v27  ;;  %v2714_v27 = vld [vmem:[%s3907_s3 + $0x5c8] sm:$0xff] }
  0x8d   :  { %4050 = vst [vmem:[#allocation145_spill] sm:$0xff] %v2694_v26  ;;  %v2719_v26 = vld [vmem:[%s3907_s3 + $0x5d0] sm:$0xff] }
  0x8e   :  { %4051 = vst [vmem:[#allocation146_spill] sm:$0xff] %v2699_v63  ;;  %v2724_v63 = vld [vmem:[%s3907_s3 + $0x5d8] sm:$0xff] }
  0x8f   :  { %4052 = vst [vmem:[#allocation147_spill] sm:$0xff] %v2704_v62  ;;  %v2729_v62 = vld [vmem:[%s3907_s3 + $0x5e0] sm:$0xff] }
  0x90   :  { %4053 = vst [vmem:[#allocation148_spill] sm:$0xff] %v2709_v29  ;;  %v2734_v29 = vld [vmem:[%s3907_s3 + $0x5e8] sm:$0xff] }
  0x91   :  { %4054 = vst [vmem:[#allocation149_spill] sm:$0xff] %v2714_v27  ;;  %v2739_v27 = vld [vmem:[%s3907_s3 + $0x5f0] sm:$0xff] }
  0x92   :  { %4055 = vst [vmem:[#allocation150_spill] sm:$0xff] %v2719_v26  ;;  %v2744_v26 = vld [vmem:[%s3907_s3 + $0x5f8] sm:$0xff] }
  0x93   :  { %4056 = vst [vmem:[#allocation151_spill] sm:$0xff] %v2724_v63  ;;  %v2749_v63 = vld [vmem:[%s3907_s3 + $0x600] sm:$0xff] }
  0x94   :  { %4057 = vst [vmem:[#allocation152_spill] sm:$0xff] %v2729_v62  ;;  %v2754_v62 = vld [vmem:[%s3907_s3 + $0x608] sm:$0xff] }
  0x95   :  { %4058 = vst [vmem:[#allocation153_spill] sm:$0xff] %v2734_v29  ;;  %v2759_v29 = vld [vmem:[%s3907_s3 + $0x610] sm:$0xff] }
  0x96   :  { %4059 = vst [vmem:[#allocation154_spill] sm:$0xff] %v2739_v27  ;;  %v2764_v27 = vld [vmem:[%s3907_s3 + $0x618] sm:$0xff] }
  0x97   :  { %4060 = vst [vmem:[#allocation155_spill] sm:$0xff] %v2744_v26  ;;  %v2769_v26 = vld [vmem:[%s3907_s3 + $0x620] sm:$0xff] }
  0x98   :  { %4061 = vst [vmem:[#allocation156_spill] sm:$0xff] %v2749_v63  ;;  %v2774_v63 = vld [vmem:[%s3907_s3 + $0x628] sm:$0xff] }
  0x99   :  { %4062 = vst [vmem:[#allocation157_spill] sm:$0xff] %v2754_v62  ;;  %v2779_v62 = vld [vmem:[%s3907_s3 + $0x630] sm:$0xff] }
  0x9a   :  { %4063 = vst [vmem:[#allocation158_spill] sm:$0xff] %v2759_v29  ;;  %v2784_v29 = vld [vmem:[%s3907_s3 + $0x638] sm:$0xff] }
  0x9b   :  { %4064 = vst [vmem:[#allocation159_spill] sm:$0xff] %v2764_v27  ;;  %v2789_v27 = vld [vmem:[%s3907_s3 + $0x640] sm:$0xff] }
  0x9c   :  { %4065 = vst [vmem:[#allocation160_spill] sm:$0xff] %v2769_v26  ;;  %v2794_v26 = vld [vmem:[%s3907_s3 + $0x648] sm:$0xff] }
  0x9d   :  { %4066 = vst [vmem:[#allocation161_spill] sm:$0xff] %v2774_v63  ;;  %v2799_v63 = vld [vmem:[%s3907_s3 + $0x650] sm:$0xff] }
  0x9e   :  { %4067 = vst [vmem:[#allocation162_spill] sm:$0xff] %v2779_v62  ;;  %v2804_v62 = vld [vmem:[%s3907_s3 + $0x658] sm:$0xff] }
  0x9f   :  { %4068 = vst [vmem:[#allocation163_spill] sm:$0xff] %v2784_v29  ;;  %v2809_v29 = vld [vmem:[%s3907_s3 + $0x660] sm:$0xff] }
  0xa0   :  { %4069 = vst [vmem:[#allocation164_spill] sm:$0xff] %v2789_v27  ;;  %v2814_v27 = vld [vmem:[%s3907_s3 + $0x668] sm:$0xff] }
  0xa1   :  { %4070 = vst [vmem:[#allocation165_spill] sm:$0xff] %v2794_v26  ;;  %v2819_v26 = vld [vmem:[%s3907_s3 + $0x670] sm:$0xff] }
  0xa2   :  { %4071 = vst [vmem:[#allocation166_spill] sm:$0xff] %v2799_v63  ;;  %v2824_v63 = vld [vmem:[%s3907_s3 + $0x678] sm:$0xff] }
  0xa3   :  { %4072 = vst [vmem:[#allocation167_spill] sm:$0xff] %v2804_v62  ;;  %v2829_v62 = vld [vmem:[%s3907_s3 + $0x680] sm:$0xff] }
  0xa4   :  { %4073 = vst [vmem:[#allocation168_spill] sm:$0xff] %v2809_v29  ;;  %v2834_v29 = vld [vmem:[%s3907_s3 + $0x688] sm:$0xff] }
  0xa5   :  { %4074 = vst [vmem:[#allocation169_spill] sm:$0xff] %v2814_v27  ;;  %v2839_v27 = vld [vmem:[%s3907_s3 + $0x690] sm:$0xff] }
  0xa6   :  { %4075 = vst [vmem:[#allocation170_spill] sm:$0xff] %v2819_v26  ;;  %v2844_v26 = vld [vmem:[%s3907_s3 + $0x698] sm:$0xff] }
  0xa7   :  { %4076 = vst [vmem:[#allocation171_spill] sm:$0xff] %v2824_v63  ;;  %v2849_v63 = vld [vmem:[%s3907_s3 + $0x6a0] sm:$0xff] }
  0xa8   :  { %4077 = vst [vmem:[#allocation172_spill] sm:$0xff] %v2829_v62  ;;  %v2854_v62 = vld [vmem:[%s3907_s3 + $0x6a8] sm:$0xff] }
  0xa9   :  { %4078 = vst [vmem:[#allocation173_spill] sm:$0xff] %v2834_v29  ;;  %v2859_v29 = vld [vmem:[%s3907_s3 + $0x6b0] sm:$0xff] }
  0xaa   :  { %4079 = vst [vmem:[#allocation174_spill] sm:$0xff] %v2839_v27  ;;  %v2864_v27 = vld [vmem:[%s3907_s3 + $0x6b8] sm:$0xff] }
  0xab   :  { %4080 = vst [vmem:[#allocation175_spill] sm:$0xff] %v2844_v26  ;;  %v2869_v26 = vld [vmem:[%s3907_s3 + $0x6c0] sm:$0xff] }
  0xac   :  { %4081 = vst [vmem:[#allocation176_spill] sm:$0xff] %v2849_v63  ;;  %v2874_v63 = vld [vmem:[%s3907_s3 + $0x6c8] sm:$0xff] }
  0xad   :  { %4082 = vst [vmem:[#allocation177_spill] sm:$0xff] %v2854_v62  ;;  %v2879_v62 = vld [vmem:[%s3907_s3 + $0x6d0] sm:$0xff] }
  0xae   :  { %4083 = vst [vmem:[#allocation178_spill] sm:$0xff] %v2859_v29  ;;  %v2884_v29 = vld [vmem:[%s3907_s3 + $0x6d8] sm:$0xff] }
  0xaf   :  { %4084 = vst [vmem:[#allocation179_spill] sm:$0xff] %v2864_v27  ;;  %v2889_v27 = vld [vmem:[%s3907_s3 + $0x6e0] sm:$0xff] }
  0xb0   :  { %4085 = vst [vmem:[#allocation180_spill] sm:$0xff] %v2869_v26  ;;  %v2894_v26 = vld [vmem:[%s3907_s3 + $0x6e8] sm:$0xff] }
  0xb1   :  { %4086 = vst [vmem:[#allocation181_spill] sm:$0xff] %v2874_v63  ;;  %v2899_v63 = vld [vmem:[%s3907_s3 + $0x6f0] sm:$0xff] }
  0xb2   :  { %4087 = vst [vmem:[#allocation182_spill] sm:$0xff] %v2879_v62  ;;  %v2904_v62 = vld [vmem:[%s3907_s3 + $0x6f8] sm:$0xff] }
  0xb3   :  { %4088 = vst [vmem:[#allocation183_spill] sm:$0xff] %v2884_v29  ;;  %v2909_v29 = vld [vmem:[%s3907_s3 + $0x700] sm:$0xff] }
  0xb4   :  { %4089 = vst [vmem:[#allocation184_spill] sm:$0xff] %v2889_v27  ;;  %v2914_v27 = vld [vmem:[%s3907_s3 + $0x708] sm:$0xff] }
  0xb5   :  { %4090 = vst [vmem:[#allocation185_spill] sm:$0xff] %v2894_v26  ;;  %v2919_v26 = vld [vmem:[%s3907_s3 + $0x710] sm:$0xff] }
  0xb6   :  { %4091 = vst [vmem:[#allocation186_spill] sm:$0xff] %v2899_v63  ;;  %v2924_v63 = vld [vmem:[%s3907_s3 + $0x718] sm:$0xff] }
  0xb7   :  { %4092 = vst [vmem:[#allocation187_spill] sm:$0xff] %v2904_v62  ;;  %v2929_v62 = vld [vmem:[%s3907_s3 + $0x720] sm:$0xff] }
  0xb8   :  { %4093 = vst [vmem:[#allocation188_spill] sm:$0xff] %v2909_v29  ;;  %v2934_v29 = vld [vmem:[%s3907_s3 + $0x728] sm:$0xff] }
  0xb9   :  { %4094 = vst [vmem:[#allocation189_spill] sm:$0xff] %v2914_v27  ;;  %v2939_v27 = vld [vmem:[%s3907_s3 + $0x730] sm:$0xff] }
  0xba   :  { %4095 = vst [vmem:[#allocation190_spill] sm:$0xff] %v2919_v26  ;;  %v2944_v26 = vld [vmem:[%s3907_s3 + $0x738] sm:$0xff] }
  0xbb   :  { %4096 = vst [vmem:[#allocation191_spill] sm:$0xff] %v2924_v63  ;;  %v2949_v63 = vld [vmem:[%s3907_s3 + $0x740] sm:$0xff] }
  0xbc   :  { %4097 = vst [vmem:[#allocation192_spill] sm:$0xff] %v2929_v62  ;;  %v2954_v62 = vld [vmem:[%s3907_s3 + $0x748] sm:$0xff] }
  0xbd   :  { %4098 = vst [vmem:[#allocation193_spill] sm:$0xff] %v2934_v29  ;;  %v2959_v29 = vld [vmem:[%s3907_s3 + $0x750] sm:$0xff] }
  0xbe   :  { %4099 = vst [vmem:[#allocation194_spill] sm:$0xff] %v2939_v27  ;;  %v2964_v27 = vld [vmem:[%s3907_s3 + $0x758] sm:$0xff] }
  0xbf   :  { %4100 = vst [vmem:[#allocation195_spill] sm:$0xff] %v2944_v26  ;;  %v2969_v26 = vld [vmem:[%s3907_s3 + $0x760] sm:$0xff] }
  0xc0   :  { %4101 = vst [vmem:[#allocation196_spill] sm:$0xff] %v2949_v63  ;;  %v2974_v63 = vld [vmem:[%s3907_s3 + $0x768] sm:$0xff] }
  0xc1   :  { %4102 = vst [vmem:[#allocation197_spill] sm:$0xff] %v2954_v62  ;;  %v2979_v62 = vld [vmem:[%s3907_s3 + $0x770] sm:$0xff] }
  0xc2   :  { %4103 = vst [vmem:[#allocation198_spill] sm:$0xff] %v2959_v29  ;;  %v2984_v29 = vld [vmem:[%s3907_s3 + $0x778] sm:$0xff] }
  0xc3   :  { %4104 = vst [vmem:[#allocation199_spill] sm:$0xff] %v2964_v27  ;;  %v2989_v27 = vld [vmem:[%s3907_s3 + $0x780] sm:$0xff] }
  0xc4   :  { %4105 = vst [vmem:[#allocation200_spill] sm:$0xff] %v2969_v26  ;;  %v2994_v26 = vld [vmem:[%s3907_s3 + $0x788] sm:$0xff] }
  0xc5   :  { %4106 = vst [vmem:[#allocation201_spill] sm:$0xff] %v2974_v63  ;;  %v2999_v63 = vld [vmem:[%s3907_s3 + $0x790] sm:$0xff] }
  0xc6   :  { %4107 = vst [vmem:[#allocation202_spill] sm:$0xff] %v2979_v62  ;;  %v3004_v62 = vld [vmem:[%s3907_s3 + $0x798] sm:$0xff] }
  0xc7   :  { %4108 = vst [vmem:[#allocation203_spill] sm:$0xff] %v2984_v29  ;;  %v3009_v29 = vld [vmem:[%s3907_s3 + $0x7a0] sm:$0xff] }
  0xc8   :  { %4109 = vst [vmem:[#allocation204_spill] sm:$0xff] %v2989_v27  ;;  %v3014_v27 = vld [vmem:[%s3907_s3 + $0x7a8] sm:$0xff] }
  0xc9   :  { %4110 = vst [vmem:[#allocation205_spill] sm:$0xff] %v2994_v26  ;;  %v3019_v26 = vld [vmem:[%s3907_s3 + $0x7b0] sm:$0xff] }
  0xca   :  { %4111 = vst [vmem:[#allocation206_spill] sm:$0xff] %v2999_v63  ;;  %v3024_v63 = vld [vmem:[%s3907_s3 + $0x7b8] sm:$0xff] }
  0xcb   :  { %4112 = vst [vmem:[#allocation207_spill] sm:$0xff] %v3004_v62  ;;  %v3029_v62 = vld [vmem:[%s3907_s3 + $0x7c0] sm:$0xff] }
  0xcc   :  { %4113 = vst [vmem:[#allocation208_spill] sm:$0xff] %v3009_v29  ;;  %v3034_v29 = vld [vmem:[%s3907_s3 + $0x7c8] sm:$0xff] }
  0xcd   :  { %4114 = vst [vmem:[#allocation209_spill] sm:$0xff] %v3014_v27  ;;  %v3039_v27 = vld [vmem:[%s3907_s3 + $0x7d0] sm:$0xff] }
  0xce   :  { %4115 = vst [vmem:[#allocation210_spill] sm:$0xff] %v3019_v26  ;;  %v3044_v26 = vld [vmem:[%s3907_s3 + $0x7d8] sm:$0xff] }
  0xcf   :  { %4116 = vst [vmem:[#allocation211_spill] sm:$0xff] %v3024_v63  ;;  %v3049_v63 = vld [vmem:[%s3907_s3 + $0x7e0] sm:$0xff] }
  0xd0   :  { %4117 = vst [vmem:[#allocation212_spill] sm:$0xff] %v3029_v62  ;;  %v3054_v62 = vld [vmem:[%s3907_s3 + $0x7e8] sm:$0xff] }
  0xd1   :  { %4118 = vst [vmem:[#allocation213_spill] sm:$0xff] %v3034_v29  ;;  %v3059_v29 = vld [vmem:[%s3907_s3 + $0x7f0] sm:$0xff] }
  0xd2   :  { %4119 = vst [vmem:[#allocation214_spill] sm:$0xff] %v3039_v27  ;;  %v3064_v27 = vld [vmem:[%s3907_s3 + $0x7f8] sm:$0xff] }
  0xd3   :  { %4120 = vst [vmem:[#allocation215_spill] sm:$0xff] %v3044_v26  ;;  %v3069_v26 = vld [vmem:[%s3907_s3 + $0x800] sm:$0xff] }
  0xd4   :  { %4121 = vst [vmem:[#allocation216_spill] sm:$0xff] %v3049_v63  ;;  %v3074_v63 = vld [vmem:[%s3907_s3 + $0x808] sm:$0xff] }
  0xd5   :  { %4122 = vst [vmem:[#allocation217_spill] sm:$0xff] %v3054_v62  ;;  %v3079_v62 = vld [vmem:[%s3907_s3 + $0x810] sm:$0xff] }
  0xd6   :  { %4123 = vst [vmem:[#allocation218_spill] sm:$0xff] %v3059_v29  ;;  %v3084_v29 = vld [vmem:[%s3907_s3 + $0x818] sm:$0xff] }
  0xd7   :  { %4124 = vst [vmem:[#allocation219_spill] sm:$0xff] %v3064_v27  ;;  %v3089_v27 = vld [vmem:[%s3907_s3 + $0x820] sm:$0xff] }
  0xd8   :  { %4125 = vst [vmem:[#allocation220_spill] sm:$0xff] %v3069_v26  ;;  %v3094_v26 = vld [vmem:[%s3907_s3 + $0x828] sm:$0xff] }
  0xd9   :  { %4126 = vst [vmem:[#allocation221_spill] sm:$0xff] %v3074_v63  ;;  %v3099_v63 = vld [vmem:[%s3907_s3 + $0x830] sm:$0xff] }
  0xda   :  { %4127 = vst [vmem:[#allocation222_spill] sm:$0xff] %v3079_v62  ;;  %v3104_v62 = vld [vmem:[%s3907_s3 + $0x838] sm:$0xff] }
  0xdb   :  { %4128 = vst [vmem:[#allocation223_spill] sm:$0xff] %v3084_v29  ;;  %v3109_v29 = vld [vmem:[%s3907_s3 + $0x840] sm:$0xff] }
  0xdc   :  { %4129 = vst [vmem:[#allocation224_spill] sm:$0xff] %v3089_v27  ;;  %v3114_v27 = vld [vmem:[%s3907_s3 + $0x848] sm:$0xff] }
  0xdd   :  { %4130 = vst [vmem:[#allocation225_spill] sm:$0xff] %v3094_v26  ;;  %v3119_v26 = vld [vmem:[%s3907_s3 + $0x850] sm:$0xff] }
  0xde   :  { %4131 = vst [vmem:[#allocation226_spill] sm:$0xff] %v3099_v63  ;;  %v3124_v63 = vld [vmem:[%s3907_s3 + $0x858] sm:$0xff] }
  0xdf   :  { %4132 = vst [vmem:[#allocation227_spill] sm:$0xff] %v3104_v62  ;;  %v3129_v62 = vld [vmem:[%s3907_s3 + $0x860] sm:$0xff] }
  0xe0   :  { %4133 = vst [vmem:[#allocation228_spill] sm:$0xff] %v3109_v29  ;;  %v3134_v29 = vld [vmem:[%s3907_s3 + $0x868] sm:$0xff] }
  0xe1   :  { %4134 = vst [vmem:[#allocation229_spill] sm:$0xff] %v3114_v27  ;;  %v3139_v27 = vld [vmem:[%s3907_s3 + $0x870] sm:$0xff] }
  0xe2   :  { %4135 = vst [vmem:[#allocation230_spill] sm:$0xff] %v3119_v26  ;;  %v3144_v26 = vld [vmem:[%s3907_s3 + $0x878] sm:$0xff] }
  0xe3   :  { %4136 = vst [vmem:[#allocation231_spill] sm:$0xff] %v3124_v63  ;;  %v3149_v63 = vld [vmem:[%s3907_s3 + $0x880] sm:$0xff] }
  0xe4   :  { %4137 = vst [vmem:[#allocation232_spill] sm:$0xff] %v3129_v62  ;;  %v3154_v62 = vld [vmem:[%s3907_s3 + $0x888] sm:$0xff] }
  0xe5   :  { %4138 = vst [vmem:[#allocation233_spill] sm:$0xff] %v3134_v29  ;;  %v3159_v29 = vld [vmem:[%s3907_s3 + $0x890] sm:$0xff] }
  0xe6   :  { %4139 = vst [vmem:[#allocation234_spill] sm:$0xff] %v3139_v27  ;;  %v3164_v27 = vld [vmem:[%s3907_s3 + $0x898] sm:$0xff] }
  0xe7   :  { %4140 = vst [vmem:[#allocation235_spill] sm:$0xff] %v3144_v26  ;;  %v3169_v26 = vld [vmem:[%s3907_s3 + $0x8a0] sm:$0xff] }
  0xe8   :  { %4141 = vst [vmem:[#allocation236_spill] sm:$0xff] %v3149_v63  ;;  %v3174_v63 = vld [vmem:[%s3907_s3 + $0x8a8] sm:$0xff] }
  0xe9   :  { %4142 = vst [vmem:[#allocation237_spill] sm:$0xff] %v3154_v62  ;;  %v3179_v62 = vld [vmem:[%s3907_s3 + $0x8b0] sm:$0xff] }
  0xea   :  { %4143 = vst [vmem:[#allocation238_spill] sm:$0xff] %v3159_v29  ;;  %v3184_v29 = vld [vmem:[%s3907_s3 + $0x8b8] sm:$0xff] }
  0xeb   :  { %4144 = vst [vmem:[#allocation239_spill] sm:$0xff] %v3164_v27  ;;  %v3189_v27 = vld [vmem:[%s3907_s3 + $0x8c0] sm:$0xff] }
  0xec   :  { %4145 = vst [vmem:[#allocation240_spill] sm:$0xff] %v3169_v26  ;;  %v3194_v26 = vld [vmem:[%s3907_s3 + $0x8c8] sm:$0xff] }
  0xed   :  { %4146 = vst [vmem:[#allocation241_spill] sm:$0xff] %v3174_v63  ;;  %v3199_v63 = vld [vmem:[%s3907_s3 + $0x8d0] sm:$0xff] }
  0xee   :  { %4147 = vst [vmem:[#allocation242_spill] sm:$0xff] %v3179_v62  ;;  %v3204_v62 = vld [vmem:[%s3907_s3 + $0x8d8] sm:$0xff] }
  0xef   :  { %4148 = vst [vmem:[#allocation243_spill] sm:$0xff] %v3184_v29  ;;  %v3209_v29 = vld [vmem:[%s3907_s3 + $0x8e0] sm:$0xff] }
  0xf0   :  { %4149 = vst [vmem:[#allocation244_spill] sm:$0xff] %v3189_v27  ;;  %v3214_v27 = vld [vmem:[%s3907_s3 + $0x8e8] sm:$0xff] }
  0xf1   :  { %4150 = vst [vmem:[#allocation245_spill] sm:$0xff] %v3194_v26  ;;  %v3219_v26 = vld [vmem:[%s3907_s3 + $0x8f0] sm:$0xff] }
  0xf2   :  { %4151 = vst [vmem:[#allocation246_spill] sm:$0xff] %v3199_v63  ;;  %v3224_v63 = vld [vmem:[%s3907_s3 + $0x8f8] sm:$0xff] }
  0xf3   :  { %4152 = vst [vmem:[#allocation247_spill] sm:$0xff] %v3204_v62  ;;  %v3229_v62 = vld [vmem:[%s3907_s3 + $0x900] sm:$0xff] }
  0xf4   :  { %4153 = vst [vmem:[#allocation248_spill] sm:$0xff] %v3209_v29  ;;  %v3234_v29 = vld [vmem:[%s3907_s3 + $0x908] sm:$0xff] }
  0xf5   :  { %4154 = vst [vmem:[#allocation249_spill] sm:$0xff] %v3214_v27  ;;  %v3239_v27 = vld [vmem:[%s3907_s3 + $0x910] sm:$0xff] }
  0xf6   :  { %4155 = vst [vmem:[#allocation250_spill] sm:$0xff] %v3219_v26  ;;  %v3244_v26 = vld [vmem:[%s3907_s3 + $0x918] sm:$0xff] }
  0xf7   :  { %4156 = vst [vmem:[#allocation251_spill] sm:$0xff] %v3224_v63  ;;  %v3249_v63 = vld [vmem:[%s3907_s3 + $0x920] sm:$0xff] }
  0xf8   :  { %4157 = vst [vmem:[#allocation252_spill] sm:$0xff] %v3229_v62  ;;  %v3254_v62 = vld [vmem:[%s3907_s3 + $0x928] sm:$0xff] }
  0xf9   :  { %4158 = vst [vmem:[#allocation253_spill] sm:$0xff] %v3234_v29  ;;  %v3259_v29 = vld [vmem:[%s3907_s3 + $0x930] sm:$0xff] }
  0xfa   :  { %4159 = vst [vmem:[#allocation254_spill] sm:$0xff] %v3239_v27  ;;  %v3264_v27 = vld [vmem:[%s3907_s3 + $0x938] sm:$0xff] }
  0xfb   :  { %4160 = vst [vmem:[#allocation255_spill] sm:$0xff] %v3244_v26  ;;  %v3269_v26 = vld [vmem:[%s3907_s3 + $0x940] sm:$0xff] }
  0xfc   :  { %4161 = vst [vmem:[#allocation256_spill] sm:$0xff] %v3249_v63  ;;  %v3274_v63 = vld [vmem:[%s3907_s3 + $0x948] sm:$0xff] }
  0xfd   :  { %4162 = vst [vmem:[#allocation257_spill] sm:$0xff] %v3254_v62  ;;  %v3279_v62 = vld [vmem:[%s3907_s3 + $0x950] sm:$0xff] }
  0xfe   :  { %4163 = vst [vmem:[#allocation258_spill] sm:$0xff] %v3259_v29  ;;  %v3284_v29 = vld [vmem:[%s3907_s3 + $0x958] sm:$0xff] }
  0xff   :  { %4164 = vst [vmem:[#allocation259_spill] sm:$0xff] %v3264_v27  ;;  %v671_v27 = vld [vmem:[%s3905_s1 + $0xf8] sm:$0xff] }
 0x100   :  { %4165 = vst [vmem:[#allocation260_spill] sm:$0xff] %v3269_v26  ;;  %v669_v26 = vld [vmem:[%s3905_s1 + $0xe8] sm:$0xff]  ;;  %768 = vmatpush.msra.mxu2 %v671_v27 }
 0x101   :  { %4166 = vst [vmem:[#allocation261_spill] sm:$0xff] %v3274_v63 }
 0x102   :  { %4167 = vst [vmem:[#allocation262_spill] sm:$0xff] %v3279_v62 }
 0x103   :  { %4168 = vst [vmem:[#allocation263_spill] sm:$0xff] %v3284_v29 }
 0x104   :  { %633 = vsyncadd [#allocation3], 38400  ;;  %v670_v63 = vld [vmem:[%s3905_s1 + $0xf0] sm:$0xff]  ;;  %v667_v62 = vld [vmem:[%s3905_s1 + $0xd8] sm:$0xff]  ;;  %769 = vmatpush.msra.mxu2 %v669_v26  ;;  %vm706_vm0 = vcmask 916480  }
 0x105   :  { %716 = vmatpush.msra.mxu0 %v670_v63  ;;  %v699_v29 = vld [vmem:[%s3905_s1 + $0x1d8] sm:$0xff]  ;;  %v668_v28 = vld [vmem:[%s3905_s1 + $0xe0] sm:$0xff]  ;;  %v697_v27 = vld [vmem:[%s3905_s1 + $0x1c8] sm:$0xff] }
 0x106   :  { %796 = vmatpush.msra.mxu3 %v699_v29  ;;  %v666_v32 = vld [vmem:[%s3905_s1 + $0xd0] sm:$0xff]  ;;  %v665_v63 = vld [vmem:[%s3905_s1 + $0xc8] sm:$0xff]  ;;  %v695_v33 = vld [vmem:[%s3905_s1 + $0x1b8] sm:$0xff]  ;;  %770 = vmatpush.msra.mxu2 %v667_v62 }
 0x107   :  { %717 = vmatpush.msra.mxu0 %v668_v28  ;;  %v698_v26 = vld [vmem:[%s3905_s1 + $0x1d0] sm:$0xff]  ;;  %v664_v29 = vld [vmem:[%s3905_s1 + $0xc0] sm:$0xff]  ;;  %v663_v31 = vld [vmem:[%s3905_s1 + $0xb8] sm:$0xff] }
 0x108   :  { %797 = vmatpush.msra.mxu3 %v697_v27  ;;  %744 = vmatpush.msra.mxu1 %v698_v26  ;;  %v693_v28 = vld [vmem:[%s3905_s1 + $0x1a8] sm:$0xff]  ;;  %v696_v30 = vld [vmem:[%s3905_s1 + $0x1c0] sm:$0xff]  ;;  %v662_v62 = vld [vmem:[%s3905_s1 + $0xb0] sm:$0xff] }
 0x109   :  { %718 = vmatpush.msra.mxu0 %v666_v32  ;;  %771 = vmatpush.msra.mxu2 %v665_v63  ;;  %v694_v27 = vld [vmem:[%s3905_s1 + $0x1b0] sm:$0xff]  ;;  %v661_v32 = vld [vmem:[%s3905_s1 + $0xa8] sm:$0xff]  ;;  %v691_v26 = vld [vmem:[%s3905_s1 + $0x198] sm:$0xff] }
 0x10a   :  { %798 = vmatpush.msra.mxu3 %v695_v33  ;;  %745 = vmatpush.msra.mxu1 %v696_v30  ;;  %v660_v33 = vld [vmem:[%s3905_s1 + $0xa0] sm:$0xff]  ;;  %v659_v12 = vld [vmem:[%s3905_s1 + $0x98] sm:$0xff]  ;;  %v689_v30 = vld [vmem:[%s3905_s1 + $0x188] sm:$0xff] }
 0x10b   :  { %719 = vmatpush.msra.mxu0 %v664_v29  ;;  %772 = vmatpush.msra.mxu2 %v663_v31  ;;  %v692_v63 = vld [vmem:[%s3905_s1 + $0x1a0] sm:$0xff]  ;;  %v658_v31 = vld [vmem:[%s3905_s1 + $0x90] sm:$0xff] }
 0x10c   :  { %799 = vmatpush.msra.mxu3 %v693_v28  ;;  %746 = vmatpush.msra.mxu1 %v694_v27  ;;  %v690_v29 = vld [vmem:[%s3905_s1 + $0x190] sm:$0xff]  ;;  %v657_v28 = vld [vmem:[%s3905_s1 + $0x88] sm:$0xff]  ;;  %v656_v27 = vld [vmem:[%s3905_s1 + $0x80] sm:$0xff] }
 0x10d   :  { %720 = vmatpush.msra.mxu0 %v662_v62  ;;  %773 = vmatpush.msra.mxu2 %v661_v32  ;;  %v687_v62 = vld [vmem:[%s3905_s1 + $0x178] sm:$0xff]  ;;  %v688_v32 = vld [vmem:[%s3905_s1 + $0x180] sm:$0xff] }
 0x10e   :  { %800 = vmatpush.msra.mxu3 %v691_v26  ;;  %747 = vmatpush.msra.mxu1 %v692_v63  ;;  %v655_v26 = vld [vmem:[%s3905_s1 + $0x78] sm:$0xff]  ;;  %v686_v63 = vld [vmem:[%s3905_s1 + $0x170] sm:$0xff] }
 0x10f   :  { %721 = vmatpush.msra.mxu0 %v660_v33  ;;  %774 = vmatpush.msra.mxu2 %v659_v12  ;;  %v685_v33 = vld [vmem:[%s3905_s1 + $0x168] sm:$0xff]  ;;  %v654_v12 = vld [vmem:[%s3905_s1 + $0x70] sm:$0xff] }
 0x110   :  { %801 = vmatpush.msra.mxu3 %v689_v30  ;;  %748 = vmatpush.msra.mxu1 %v690_v29  ;;  %v653_v30 = vld [vmem:[%s3905_s1 + $0x68] sm:$0xff]  ;;  %v652_v29 = vld [vmem:[%s3905_s1 + $0x60] sm:$0xff] }
 0x111   :  { %722 = vmatpush.msra.mxu0 %v658_v31  ;;  %775 = vmatpush.msra.mxu2 %v657_v28  ;;  %v683_v31 = vld [vmem:[%s3905_s1 + $0x158] sm:$0xff]  ;;  %v684_v28 = vld [vmem:[%s3905_s1 + $0x160] sm:$0xff] }
 0x112   :  { %802 = vmatpush.msra.mxu3 %v687_v62  ;;  %749 = vmatpush.msra.mxu1 %v688_v32  ;;  %v651_v62 = vld [vmem:[%s3905_s1 + $0x58] sm:$0xff]  ;;  %v650_v32 = vld [vmem:[%s3905_s1 + $0x50] sm:$0xff] }
 0x113   :  { %723 = vmatpush.msra.mxu0 %v656_v27  ;;  %776 = vmatpush.msra.mxu2 %v655_v26  ;;  %v681_v27 = vld [vmem:[%s3905_s1 + $0x148] sm:$0xff]  ;;  %v682_v26 = vld [vmem:[%s3905_s1 + $0x150] sm:$0xff] }
 0x114   :  { %803 = vmatpush.msra.mxu3 %v685_v33  ;;  %750 = vmatpush.msra.mxu1 %v686_v63  ;;  %v649_v33 = vld [vmem:[%s3905_s1 + $0x48] sm:$0xff]  ;;  %v648_v63 = vld [vmem:[%s3905_s1 + $0x40] sm:$0xff] }
 0x115   :  { %724 = vmatpush.msra.mxu0 %v654_v12  ;;  %777 = vmatpush.msra.mxu2 %v653_v30  ;;  %v679_v12 = vld [vmem:[%s3905_s1 + $0x138] sm:$0xff]  ;;  %v680_v30 = vld [vmem:[%s3905_s1 + $0x140] sm:$0xff] }
 0x116   :  { %804 = vmatpush.msra.mxu3 %v683_v31  ;;  %751 = vmatpush.msra.mxu1 %v684_v28  ;;  %v647_v31 = vld [vmem:[%s3905_s1 + $0x38] sm:$0xff]  ;;  %v646_v28 = vld [vmem:[%s3905_s1 + $0x30] sm:$0xff] }
 0x117   :  { %725 = vmatpush.msra.mxu0 %v652_v29  ;;  %778 = vmatpush.msra.mxu2 %v651_v62  ;;  %v677_v29 = vld [vmem:[%s3905_s1 + $0x128] sm:$0xff]  ;;  %v678_v62 = vld [vmem:[%s3905_s1 + $0x130] sm:$0xff] }
 0x118   :  { %805 = vmatpush.msra.mxu3 %v681_v27  ;;  %752 = vmatpush.msra.mxu1 %v682_v26  ;;  %v645_v27 = vld [vmem:[%s3905_s1 + $0x28] sm:$0xff]  ;;  %v644_v26 = vld [vmem:[%s3905_s1 + $0x20] sm:$0xff] }
 0x119   :  { %726 = vmatpush.msra.mxu0 %v650_v32  ;;  %779 = vmatpush.msra.mxu2 %v649_v33  ;;  %v675_v32 = vld [vmem:[%s3905_s1 + $0x118] sm:$0xff]  ;;  %v676_v33 = vld [vmem:[%s3905_s1 + $0x120] sm:$0xff] }
 0x11a   :  { %806 = vmatpush.msra.mxu3 %v679_v12  ;;  %753 = vmatpush.msra.mxu1 %v680_v30  ;;  %v643_v12 = vld [vmem:[%s3905_s1 + $0x18] sm:$0xff]  ;;  %v635_v30 = vld [vmem:[%s3904_s0 + $0x8] sm:$0xff] }
 0x11b   :  { %727 = vmatpush.msra.mxu0 %v648_v63  ;;  %780 = vmatpush.msra.mxu2 %v647_v31  ;;  %v673_v63 = vld [vmem:[%s3905_s1 + $0x108] sm:$0xff]  ;;  %v642_v31 = vld [vmem:[%s3905_s1 + $0x10] sm:$0xff] }
 0x11c   :  { %807 = vmatpush.msra.mxu3 %v677_v29  ;;  %754 = vmatpush.msra.mxu1 %v678_v62  ;;  %v641_v29 = vld [vmem:[%s3905_s1 + $0x8] sm:$0xff]  ;;  %v634_v62 = vld [vmem:[%s3904_s0] sm:$0xff] }
 0x11d   :  { %728 = vmatpush.msra.mxu0 %v646_v28  ;;  %781 = vmatpush.msra.mxu2 %v645_v27  ;;  %v674_v28 = vld [vmem:[%s3905_s1 + $0x110] sm:$0xff]  ;;  %v640_v27 = vld [vmem:[%s3905_s1] sm:$0xff] }
 0x11e   :  { %808 = vmatpush.msra.mxu3 %v675_v32  ;;  %755 = vmatpush.msra.mxu1 %v676_v33  ;;  %v672_v32 = vld [vmem:[%s3905_s1 + $0x100] sm:$0xff]  ;;  %v636_v33 = vld [vmem:[%s3904_s0 + $0x10] sm:$0xff] }
 0x11f   :  { %729 = vmatpush.msra.mxu0 %v644_v26  ;;  %782 = vmatpush.msra.mxu2 %v643_v12  ;;  %v637_v26 = vld [vmem:[%s3904_s0 + $0x18] sm:$0xff]  ;;  %v639_v12 = vld [vmem:[%s3904_s0 + $0x28] sm:$0xff] }
 0x120   :  { %809 = vmatpush.msra.mxu3 %v673_v63  ;;  %756 = vmatpush.msra.mxu1 %v674_v28  ;;  %v638_v63 = vld [vmem:[%s3904_s0 + $0x20] sm:$0xff] }
 0x121   :  { %1730 = vmatmul.msk.f32.vlgmr.msra.gmra.mxu3 %vm706_vm0, %v635_v30  ;;  %730 = vmatpush.msra.mxu0 %v642_v31 }
 0x122   :  { %783 = vmatpush.msra.mxu2 %v641_v29  ;;  %757 = vmatpush.msra.mxu1 %v672_v32 }
 0x123   :  { %784 = vmatmul.f32.vlgmr.msra.gmra.mxu2 %v634_v62  ;;  %731 = vmatpush.msra.mxu0 %v640_v27 }
 0x124   :  { %732 = vmatmul.f32.vlgmr.msra.gmra.mxu0 %v634_v62  ;;  %1727 = vmatmul.msk.f32.vlgmr.msra.gmra.mxu1 %vm706_vm0, %v635_v30  ;;  %v700_v30 = vld [vmem:[%s3906_s2] sm:$0x3] }
 0x125   :  { %v702_v31 = vperm.slane %v700_v30, 0  ;;  %v703_v27 = vperm.slane %v700_v30, 1  ;;  %1011 = vmatpush.msrb.mxu3 %v2379_v61  ;;  %1057 = vmatpush.msrb.mxu2 %v2384_v60 }
 0x129   :  { %1731 = vmatmul.msk.f32.gmra.mxu3 %vm706_vm0, %v637_v26 }
 0x12b   :  { %787 = vmatmul.f32.gmra.mxu2 %v636_v33 }
 0x12c   :  { %735 = vmatmul.f32.gmra.mxu0 %v636_v33  ;;  %1728 = vmatmul.msk.f32.gmra.mxu1 %vm706_vm0, %v637_v26 }
 0x131   :  { %1732 = vmatmul.msk.f32.gmra.mxu3 %vm706_vm0, %v639_v12 }
 0x133   :  { %790 = vmatmul.f32.gmra.mxu2 %v638_v63 }
 0x134   :  { %738 = vmatmul.f32.gmra.mxu0 %v638_v63  ;;  %1729 = vmatmul.msk.f32.gmra.mxu1 %vm706_vm0, %v639_v12 }
 0x1a1   :  { %v733_v29 = vpop.f32.mrf.mxu0  ;;  %v759_v62 = vpop.f32.mrf.mxu1 }
 0x1a2   :  { %v734_v28 = vadd.f32 %v733_v29, %v702_v31 }
 0x1a4   :  { %v760_v32 = vadd.f32 %v759_v62, %v734_v28  ;;  %v811_v26 = vpop.f32.mrf.mxu3 }
 0x1a6   :  { %v785_v33 = vpop.f32.mrf.mxu2  ;;  %v3493_v46 = vmax.f32 %v760_v32, 0.0 }
 0x1a7   :  { %v786_v1 = vadd.f32 %v785_v33, %v703_v27 }
 0x1a8   :  { %4169 = vst [vmem:[#allocation264_spill] sm:$0xff] %v3493_v46 }
 0x1a9   :  { %v812_v35 = vadd.f32 %v811_v26, %v786_v1  ;;  %v736_v15 = vpop.f32.mrf.mxu0  ;;  %v762_v49 = vpop.f32.mrf.mxu1 }
 0x1aa   :  { %v737_v63 = vadd.f32 %v736_v15, %v702_v31 }
 0x1ab   :  { %v3495_v12 = vmax.f32 %v812_v35, 0.0 }
 0x1ac   :  { %v763_v0 = vadd.f32 %v762_v49, %v737_v63  ;;  %v814_v34 = vpop.f32.mrf.mxu3 }
 0x1ae   :  { %v788_v14 = vpop.f32.mrf.mxu2  ;;  %v3497_v48 = vmax.f32 %v763_v0, 0.0 }
 0x1af   :  { %v789_v29 = vadd.f32 %v788_v14, %v703_v27 }
 0x1b1   :  { %v815_v3 = vadd.f32 %v814_v34, %v789_v29  ;;  %v739_v30 = vpop.f32.mrf.mxu0  ;;  %v765_v62 = vpop.f32.mrf.mxu1 }
 0x1b2   :  { %v740_v28 = vadd.f32 %v739_v30, %v702_v31 }
 0x1b3   :  { %v3499_v37 = vmax.f32 %v815_v3, 0.0 }
 0x1b4   :  { %v766_v32 = vadd.f32 %v765_v62, %v740_v28  ;;  %v817_v15 = vpop.f32.mrf.mxu3 }
 0x1b6   :  { %v791_v33 = vpop.f32.mrf.mxu2  ;;  %v3501_v1 = vmax.f32 %v766_v32, 0.0 }
 0x1b7   :  { %v792_v26 = vadd.f32 %v791_v33, %v703_v27 }
 0x1b9   :  { %v818_v35 = vadd.f32 %v817_v15, %v792_v26 }
 0x1bb   :  { %v3503_v46 = vmax.f32 %v818_v35, 0.0 }
 0x1bc   :  { %1754 = dma.done.wait [#allocation3], 38400 }
 0x1bd   :  { %1755 = vsyncadd [#allocation3], 4294928896  ;;  %986 = vmatpush.msrb.mxu1 %v2239_v47  ;;  %1032 = vmatpush.msrb.mxu0 %v2244_v13  ;;  %v4170_v0 = vld [vmem:[#allocation76_spill] sm:$0xff]  ;;  %v4171_v3 = vld [vmem:[#allocation77_spill] sm:$0xff]  ;;  %v910_v47 = vrot.slane %v3499_v37, 1  ;;  %vm905_vm1 = vcmask 1046528  }
 0x1be   :  { %1012 = vmatpush.msrb.mxu3 %v2369_v58  ;;  %1058 = vmatpush.msrb.mxu2 %v2374_v24  ;;  %v4181_v13 = vld [vmem:[#allocation79_spill] sm:$0xff]  ;;  %v4182_v14 = vld [vmem:[#allocation36_spill] sm:$0xff]  ;;  %v4191_v24 = vld [vmem:[#allocation33_spill] sm:$0xff]  ;;  %v907_v62 = vrot.slane %v3497_v48, 1  ;;  %v917_v32 = vrot.slane %v3499_v37, 5  ;;  %v918_v33 = vrot.slane %v3503_v46, 5 }
 0x1bf   :  { %987 = vmatpush.msrb.mxu1 %v2229_v44  ;;  %1033 = vmatpush.msrb.mxu0 %v2234_v10  ;;  %v4179_v10 = vld [vmem:[#allocation73_spill] sm:$0xff]  ;;  %v4193_v34 = vld [vmem:[#allocation67_spill] sm:$0xff]  ;;  %v4202_v49 = vld [vmem:[#allocation26_spill] sm:$0xff]  ;;  %vm913_vm2 = vcmask 1042432   ;;  %vm835_vm3 = vcmask 1043456   ;;  %vm1174_vm4 = vcmask 1045504  }
 0x1c0   :  { %1013 = vmatpush.msrb.mxu3 %v2359_v59  ;;  %1059 = vmatpush.msrb.mxu2 %v2364_v25  ;;  %v4192_v25 = vld [vmem:[#allocation66_spill] sm:$0xff]  ;;  %v4201_v44 = vld [vmem:[#allocation63_spill] sm:$0xff]  ;;  %v4211_v59 = vld [vmem:[#allocation56_spill] sm:$0xff]  ;;  %vm1182_vm5 = vcmask 1041408   ;;  %vm1351_vm6 = vcmask 1044480   ;;  %vm1359_vm7 = vcmask 1040384  }
 0x1c1   :  { %988 = vmatpush.msrb.mxu1 %v2219_v45  ;;  %1034 = vmatpush.msrb.mxu0 %v2224_v11  ;;  %v4180_v11 = vld [vmem:[#allocation78_spill] sm:$0xff]  ;;  %v909_v45 = vrot.slane %v3495_v12, 1  ;;  %v4212_v60 = vld [vmem:[#allocation23_spill] sm:$0xff]  ;;  %v4213_v61 = vld [vmem:[#allocation57_spill] sm:$0xff]  ;;  %vm1709_vm8 = vcmask 261120  }
 0x1c2   :  { %1014 = vmatpush.msrb.mxu3 %v2349_v56  ;;  %1060 = vmatpush.msrb.mxu2 %v2354_v22  ;;  %v4189_v22 = vld [vmem:[#allocation69_spill] sm:$0xff]  ;;  %v4209_v56 = vld [vmem:[#allocation59_spill] sm:$0xff]  ;;  %v4210_v58 = vld [vmem:[#allocation22_spill] sm:$0xff] }
 0x1c3   :  { %989 = vmatpush.msrb.mxu1 %v2209_v42  ;;  %1035 = vmatpush.msrb.mxu0 %v2214_v8  ;;  %v4176_v8 = vld [vmem:[#allocation80_spill] sm:$0xff]  ;;  %v4199_v42 = vld [vmem:[#allocation62_spill] sm:$0xff]  ;;  %v4216_v63 = vld [vmem:[#allocation21_spill] sm:$0xff] }
 0x1c4   :  { %1015 = vmatpush.msrb.mxu3 %v2339_v57  ;;  %1061 = vmatpush.msrb.mxu2 %v2344_v23  ;;  %v4190_v23 = vld [vmem:[#allocation32_spill] sm:$0xff]  ;;  %v911_v57 = vsel %vm905_vm1, %v909_v45, %v910_v47  ;;  %v4215_v27 = vld [vmem:[#allocation54_spill] sm:$0xff]  ;;  %v4217_v29 = vld [vmem:[#allocation55_spill] sm:$0xff] }
 0x1c5   :  { %990 = vmatpush.msrb.mxu1 %v2199_v43  ;;  %1036 = vmatpush.msrb.mxu0 %v2204_v9  ;;  %v4177_v9 = vld [vmem:[#allocation81_spill] sm:$0xff]  ;;  %v4214_v31 = vld [vmem:[#allocation20_spill] sm:$0xff]  ;;  %v4219_v15 = vld [vmem:[#allocation18_spill] sm:$0xff] }
 0x1c6   :  { %1016 = vmatpush.msrb.mxu3 %v2329_v54  ;;  %1062 = vmatpush.msrb.mxu2 %v2334_v20  ;;  %v4187_v20 = vld [vmem:[#allocation35_spill] sm:$0xff]  ;;  %v4200_v43 = vld [vmem:[#allocation29_spill] sm:$0xff]  ;;  %v4207_v54 = vld [vmem:[#allocation58_spill] sm:$0xff] }
 0x1c7   :  { %991 = vmatpush.msrb.mxu1 %v2189_v40  ;;  %1037 = vmatpush.msrb.mxu0 %v2194_v6  ;;  %v4173_v6 = vld [vmem:[#allocation83_spill] sm:$0xff]  ;;  %v4197_v40 = vld [vmem:[#allocation65_spill] sm:$0xff]  ;;  %v4218_v30 = vld [vmem:[#allocation264_spill] sm:$0xff] }
 0x1c8   :  { %1017 = vmatpush.msrb.mxu3 %v2319_v55  ;;  %1063 = vmatpush.msrb.mxu2 %v2324_v21  ;;  %v4188_v21 = vld [vmem:[#allocation68_spill] sm:$0xff]  ;;  %v4208_v55 = vld [vmem:[#allocation25_spill] sm:$0xff]  ;;  %v906_v28 = vrot.slane %v4218_v30, 1  ;;  %v4221_v35 = vld [vmem:[#allocation19_spill] sm:$0xff] }
 0x1c9   :  { %992 = vmatpush.msrb.mxu1 %v2179_v41  ;;  %1038 = vmatpush.msrb.mxu0 %v2184_v7  ;;  %v4175_v7 = vld [vmem:[#allocation75_spill] sm:$0xff]  ;;  %v4198_v41 = vld [vmem:[#allocation28_spill] sm:$0xff]  ;;  %v4249_v45 = vld [vmem:[#allocation38_spill] sm:$0xff] }
 0x1ca   :  { %1018 = vmatpush.msrb.mxu3 %v2309_v52  ;;  %1064 = vmatpush.msrb.mxu2 %v2314_v18  ;;  %v4185_v18 = vld [vmem:[#allocation71_spill] sm:$0xff]  ;;  %v4205_v52 = vld [vmem:[#allocation61_spill] sm:$0xff]  ;;  %v4220_v26 = vld [vmem:[#allocation52_spill] sm:$0xff] }
 0x1cb   :  { %993 = vmatpush.msrb.mxu1 %v2169_v38  ;;  %1039 = vmatpush.msrb.mxu0 %v2174_v4  ;;  %v4172_v4 = vld [vmem:[#allocation82_spill] sm:$0xff]  ;;  %v4195_v38 = vld [vmem:[#allocation64_spill] sm:$0xff]  ;;  %v4250_v47 = vld [vmem:[#allocation39_spill] sm:$0xff] }
 0x1cc   :  { %1019 = vmatpush.msrb.mxu3 %v2299_v53  ;;  %1065 = vmatpush.msrb.mxu2 %v2304_v19  ;;  %v4186_v19 = vld [vmem:[#allocation34_spill] sm:$0xff]  ;;  %v4206_v53 = vld [vmem:[#allocation24_spill] sm:$0xff] }
 0x1cd   :  { %994 = vmatpush.msrb.mxu1 %v2159_v39  ;;  %1040 = vmatpush.msrb.mxu0 %v2164_v5  ;;  %v4174_v5 = vld [vmem:[#allocation74_spill] sm:$0xff]  ;;  %v4196_v39 = vld [vmem:[#allocation31_spill] sm:$0xff] }
 0x1ce   :  { %1020 = vmatpush.msrb.mxu3 %v2289_v50  ;;  %1066 = vmatpush.msrb.mxu2 %v2294_v16  ;;  %v4183_v16 = vld [vmem:[#allocation37_spill] sm:$0xff]  ;;  %v4203_v50 = vld [vmem:[#allocation60_spill] sm:$0xff] }
 0x1cf   :  { %995 = vmatpush.msrb.mxu1 %v2149_v36  ;;  %1041 = vmatpush.msrb.mxu0 %v2154_v2  ;;  %v4178_v2 = vld [vmem:[#allocation72_spill] sm:$0xff]  ;;  %v4194_v36 = vld [vmem:[#allocation30_spill] sm:$0xff] }
 0x1d0   :  { %1021 = vmatpush.msrb.mxu3 %v2279_v51  ;;  %1067 = vmatpush.msrb.mxu2 %v2284_v17  ;;  %v4184_v17 = vld [vmem:[#allocation70_spill] sm:$0xff]  ;;  %v4204_v51 = vld [vmem:[#allocation27_spill] sm:$0xff] }
 0x1d1   :  { %996 = vmatpush.msrb.mxu1 %v4170_v0  ;;  %1042 = vmatpush.msrb.mxu0 %v4171_v3  ;;  %v4222_v0 = vld [vmem:[#allocation53_spill] sm:$0xff]  ;;  %v4223_v3 = vld [vmem:[#allocation16_spill] sm:$0xff] }
 0x1d2   :  { %1022 = vmatpush.msrb.mxu3 %v4172_v4  ;;  %1068 = vmatpush.msrb.mxu2 %v4173_v6  ;;  %v4224_v4 = vld [vmem:[#allocation50_spill] sm:$0xff]  ;;  %v4225_v6 = vld [vmem:[#allocation17_spill] sm:$0xff] }
 0x1d3   :  { %997 = vmatpush.msrb.mxu1 %v4174_v5  ;;  %1043 = vmatpush.msrb.mxu0 %v4175_v7  ;;  %v4226_v5 = vld [vmem:[#allocation51_spill] sm:$0xff]  ;;  %v908_v7 = vsel %vm905_vm1, %v906_v28, %v907_v62  ;;  %v4268_v28 = vld [vmem:[#allocation132_spill] sm:$0xff] }
 0x1d4   :  { %1023 = vmatpush.msrb.mxu3 %v4176_v8  ;;  %1069 = vmatpush.msrb.mxu2 %v4177_v9  ;;  %v919_v8 = vsel %vm913_vm2, %v917_v32, %v918_v33  ;;  %v4227_v9 = vld [vmem:[#allocation14_spill] sm:$0xff]  ;;  %v4269_v62 = vld [vmem:[#allocation107_spill] sm:$0xff]  ;;  %v4270_v32 = vld [vmem:[#allocation133_spill] sm:$0xff] }
 0x1d5   :  { %998 = vmatpush.msrb.mxu1 %v4178_v2  ;;  %1044 = vmatpush.msrb.mxu0 %v4179_v10  ;;  %v4228_v2 = vld [vmem:[#allocation48_spill] sm:$0xff]  ;;  %v4229_v10 = vld [vmem:[#allocation15_spill] sm:$0xff] }
 0x1d6   :  { %1024 = vmatpush.msrb.mxu3 %v4180_v11  ;;  %1070 = vmatpush.msrb.mxu2 %v4181_v13  ;;  %v4230_v11 = vld [vmem:[#allocation49_spill] sm:$0xff]  ;;  %v4231_v13 = vld [vmem:[#allocation12_spill] sm:$0xff] }
 0x1d7   :  { %999 = vmatpush.msrb.mxu1 %v4184_v17  ;;  %1045 = vmatpush.msrb.mxu0 %v4185_v18  ;;  %v4234_v17 = vld [vmem:[#allocation47_spill] sm:$0xff]  ;;  %v914_v18 = vrot.slane %v3497_v48, 5  ;;  %v4271_v33 = vld [vmem:[#allocation104_spill] sm:$0xff] }
 0x1d8   :  { %1082 = vmatpush.msra.mxu3 %v4182_v14  ;;  %1128 = vmatpush.msra.mxu2 %v4183_v16  ;;  %v4232_v14 = vld [vmem:[#allocation46_spill] sm:$0xff]  ;;  %v4233_v16 = vld [vmem:[#allocation13_spill] sm:$0xff] }
 0x1d9   :  { %1000 = vmatpush.msrb.mxu1 %v4188_v21  ;;  %1046 = vmatpush.msrb.mxu0 %v4189_v22  ;;  %v4236_v21 = vld [vmem:[#allocation44_spill] sm:$0xff]  ;;  %v4237_v22 = vld [vmem:[#allocation11_spill] sm:$0xff] }
 0x1da   :  { %1083 = vmatpush.msra.mxu3 %v4186_v19  ;;  %1129 = vmatpush.msra.mxu2 %v4187_v20  ;;  %v915_v19 = vrot.slane %v3501_v1, 5  ;;  %v4235_v20 = vld [vmem:[#allocation10_spill] sm:$0xff] }
 0x1db   :  { %1001 = vmatpush.msrb.mxu1 %v4192_v25  ;;  %1047 = vmatpush.msrb.mxu0 %v4193_v34  ;;  %v4240_v25 = vld [vmem:[#allocation42_spill] sm:$0xff]  ;;  %v4241_v34 = vld [vmem:[#allocation9_spill] sm:$0xff] }
 0x1dc   :  { %1084 = vmatpush.msra.mxu3 %v4190_v23  ;;  %1130 = vmatpush.msra.mxu2 %v4191_v24  ;;  %v4238_v23 = vld [vmem:[#allocation45_spill] sm:$0xff]  ;;  %v4239_v24 = vld [vmem:[#allocation8_spill] sm:$0xff] }
 0x1dd   :  { %1107 = vmatpush.msra.mxu1 %v4195_v38  ;;  %1153 = vmatpush.msra.mxu0 %v4197_v40  ;;  %v916_v38 = vsel %vm913_vm2, %v914_v18, %v915_v19  ;;  %v4244_v40 = vld [vmem:[#allocation40_spill] sm:$0xff]  ;;  %v839_v18 = vrot.slane %v3499_v37, 4  ;;  %v840_v19 = vrot.slane %v3503_v46, 4 }
 0x1de   :  { %1085 = vmatpush.msra.mxu3 %v4194_v36  ;;  %1131 = vmatpush.msra.mxu2 %v4196_v39  ;;  %v4242_v36 = vld [vmem:[#allocation43_spill] sm:$0xff]  ;;  %v4243_v39 = vld [vmem:[#allocation6_spill] sm:$0xff] }
 0x1df   :  { %1108 = vmatpush.msra.mxu1 %v4199_v42  ;;  %1154 = vmatpush.msra.mxu0 %v4201_v44  ;;  %v4246_v42 = vld [vmem:[#allocation41_spill] sm:$0xff]  ;;  %v4248_v44 = vld [vmem:[#allocation143_spill] sm:$0xff] }
 0x1e0   :  { %1086 = vmatpush.msra.mxu3 %v4198_v41  ;;  %1132 = vmatpush.msra.mxu2 %v4200_v43  ;;  %v4245_v41 = vld [vmem:[#allocation7_spill] sm:$0xff]  ;;  %v4247_v43 = vld [vmem:[#allocation142_spill] sm:$0xff] }
 0x1e1   :  { %1109 = vmatpush.msra.mxu1 %v4203_v50  ;;  %1155 = vmatpush.msra.mxu0 %v4205_v52  ;;  %v4252_v50 = vld [vmem:[#allocation140_spill] sm:$0xff]  ;;  %v4254_v52 = vld [vmem:[#allocation141_spill] sm:$0xff] }
 0x1e2   :  { %1087 = vmatpush.msra.mxu3 %v4202_v49  ;;  %1133 = vmatpush.msra.mxu2 %v4204_v51  ;;  %v4251_v49 = vld [vmem:[#allocation114_spill] sm:$0xff]  ;;  %v4253_v51 = vld [vmem:[#allocation115_spill] sm:$0xff] }
 0x1e3   :  { %1110 = vmatpush.msra.mxu1 %v4207_v54  ;;  %1156 = vmatpush.msra.mxu0 %v4209_v56  ;;  %v4256_v54 = vld [vmem:[#allocation138_spill] sm:$0xff]  ;;  %v4258_v56 = vld [vmem:[#allocation139_spill] sm:$0xff] }
 0x1e4   :  { %1088 = vmatpush.msra.mxu3 %v4206_v53  ;;  %1134 = vmatpush.msra.mxu2 %v4208_v55  ;;  %v4255_v53 = vld [vmem:[#allocation112_spill] sm:$0xff]  ;;  %v4257_v55 = vld [vmem:[#allocation113_spill] sm:$0xff] }
 0x1e5   :  { %1111 = vmatpush.msra.mxu1 %v4211_v59  ;;  %1157 = vmatpush.msra.mxu0 %v4213_v61  ;;  %v4261_v59 = vld [vmem:[#allocation111_spill] sm:$0xff]  ;;  %v4263_v61 = vld [vmem:[#allocation108_spill] sm:$0xff] }
 0x1e6   :  { %1089 = vmatpush.msra.mxu3 %v4210_v58  ;;  %1135 = vmatpush.msra.mxu2 %v4212_v60  ;;  %v4260_v58 = vld [vmem:[#allocation136_spill] sm:$0xff]  ;;  %v4262_v60 = vld [vmem:[#allocation137_spill] sm:$0xff] }
 0x1e7   :  { %1733 = vmatmul.msk.f32.vlgmr.msrb.gmra.mxu3 %vm706_vm0, %v911_v57  ;;  %1735 = vmatmul.msk.f32.vlgmr.msrb.gmra.mxu2 %vm706_vm0, %v911_v57  ;;  %v4259_v57 = vld [vmem:[#allocation110_spill] sm:$0xff] }
 0x1e8   :  { %1090 = vmatpush.msra.mxu3 %v4214_v31  ;;  %1112 = vmatpush.msra.mxu1 %v4215_v27  ;;  %v4264_v31 = vld [vmem:[#allocation134_spill] sm:$0xff]  ;;  %v4265_v27 = vld [vmem:[#allocation109_spill] sm:$0xff] }
 0x1e9   :  { %1136 = vmatpush.msra.mxu2 %v4216_v63  ;;  %1158 = vmatpush.msra.mxu0 %v4217_v29  ;;  %v4266_v63 = vld [vmem:[#allocation135_spill] sm:$0xff]  ;;  %v4267_v29 = vld [vmem:[#allocation106_spill] sm:$0xff] }
 0x1ea   :  { %1091 = vmatpush.msra.mxu3 %v4219_v15  ;;  %1113 = vmatpush.msra.mxu1 %v4220_v26  ;;  %v4272_v15 = vld [vmem:[#allocation130_spill] sm:$0xff]  ;;  %v4273_v26 = vld [vmem:[#allocation105_spill] sm:$0xff] }
 0x1eb   :  { %1137 = vmatpush.msra.mxu2 %v4221_v35  ;;  %1159 = vmatpush.msra.mxu0 %v4222_v0  ;;  %v4274_v35 = vld [vmem:[#allocation131_spill] sm:$0xff]  ;;  %v836_v0 = vrot.slane %v3497_v48, 4 }
 0x1ec   :  { %1092 = vmatpush.msra.mxu3 %v4223_v3  ;;  %1114 = vmatpush.msra.mxu1 %v4224_v4  ;;  %v837_v3 = vrot.slane %v3501_v1, 4  ;;  %v4275_v4 = vld [vmem:[#allocation102_spill] sm:$0xff] }
 0x1ed   :  { %1138 = vmatpush.msra.mxu2 %v4225_v6  ;;  %1160 = vmatpush.msra.mxu0 %v4226_v5  ;;  %v4276_v6 = vld [vmem:[#allocation128_spill] sm:$0xff]  ;;  %v4277_v5 = vld [vmem:[#allocation103_spill] sm:$0xff] }
 0x1ee   :  { %1093 = vmatpush.msra.mxu3 %v4227_v9  ;;  %1115 = vmatpush.msra.mxu1 %v4228_v2  ;;  %v4280_v9 = vld [vmem:[#allocation126_spill] sm:$0xff]  ;;  %v4281_v2 = vld [vmem:[#allocation101_spill] sm:$0xff] }
 0x1ef   :  { %1139 = vmatpush.msra.mxu2 %v4229_v10  ;;  %1161 = vmatpush.msra.mxu0 %v4230_v11  ;;  %v4282_v10 = vld [vmem:[#allocation127_spill] sm:$0xff]  ;;  %v838_v11 = vsel %vm835_vm3, %v836_v0, %v837_v3 }
 0x1f0   :  { %1002 = vmatmul.f32.vlgmr.msrb.gmra.mxu1 %v908_v7  ;;  %1734 = vmatmul.msk.f32.gmra.mxu3 %vm706_vm0, %v919_v8  ;;  %v4318_v3 = vld [vmem:[#allocation203_spill] sm:$0xff] }
 0x1f1   :  { %1048 = vmatmul.f32.vlgmr.msrb.gmra.mxu0 %v908_v7  ;;  %1736 = vmatmul.msk.f32.gmra.mxu2 %vm706_vm0, %v919_v8  ;;  %v4278_v7 = vld [vmem:[#allocation129_spill] sm:$0xff]  ;;  %v4279_v8 = vld [vmem:[#allocation100_spill] sm:$0xff] }
 0x1f2   :  { %1094 = vmatpush.msra.mxu3 %v4231_v13  ;;  %1116 = vmatpush.msra.mxu1 %v4232_v14  ;;  %v4283_v13 = vld [vmem:[#allocation98_spill] sm:$0xff]  ;;  %v4284_v14 = vld [vmem:[#allocation124_spill] sm:$0xff] }
 0x1f3   :  { %1140 = vmatpush.msra.mxu2 %v4233_v16  ;;  %1162 = vmatpush.msra.mxu0 %v4234_v17  ;;  %v4285_v16 = vld [vmem:[#allocation99_spill] sm:$0xff]  ;;  %v4286_v17 = vld [vmem:[#allocation125_spill] sm:$0xff] }
 0x1f4   :  { %1095 = vmatpush.msra.mxu3 %v4235_v20  ;;  %1117 = vmatpush.msra.mxu1 %v4236_v21  ;;  %v4287_v20 = vld [vmem:[#allocation96_spill] sm:$0xff]  ;;  %v4288_v21 = vld [vmem:[#allocation122_spill] sm:$0xff] }
 0x1f5   :  { %1141 = vmatpush.msra.mxu2 %v4237_v22  ;;  %1163 = vmatpush.msra.mxu0 %v4238_v23  ;;  %v4289_v22 = vld [vmem:[#allocation97_spill] sm:$0xff]  ;;  %v4290_v23 = vld [vmem:[#allocation123_spill] sm:$0xff] }
 0x1f6   :  { %1096 = vmatpush.msra.mxu3 %v4239_v24  ;;  %1118 = vmatpush.msra.mxu1 %v4240_v25  ;;  %v4291_v24 = vld [vmem:[#allocation94_spill] sm:$0xff]  ;;  %v4292_v25 = vld [vmem:[#allocation120_spill] sm:$0xff] }
 0x1f7   :  { %1142 = vmatpush.msra.mxu2 %v4241_v34  ;;  %1164 = vmatpush.msra.mxu0 %v4242_v36  ;;  %v1178_v34 = vrot.slane %v3495_v12, 2  ;;  %v1179_v36 = vrot.slane %v3499_v37, 2 }
 0x1f8   :  { %1097 = vmatpush.msra.mxu3 %v4243_v39  ;;  %1119 = vmatpush.msra.mxu1 %v4244_v40  ;;  %v4294_v39 = vld [vmem:[#allocation121_spill] sm:$0xff]  ;;  %v841_v40 = vsel %vm835_vm3, %v839_v18, %v840_v19  ;;  %v4329_v19 = vld [vmem:[#allocation163_spill] sm:$0xff] }
 0x1f9   :  { %1143 = vmatpush.msra.mxu2 %v4245_v41  ;;  %1165 = vmatpush.msra.mxu0 %v4246_v42  ;;  %v4295_v41 = vld [vmem:[#allocation92_spill] sm:$0xff]  ;;  %v4296_v42 = vld [vmem:[#allocation118_spill] sm:$0xff] }
 0x1fa   :  { %1005 = vmatmul.f32.gmra.mxu1 %v916_v38  ;;  %1051 = vmatmul.f32.gmra.mxu0 %v916_v38  ;;  %v4293_v38 = vld [vmem:[#allocation95_spill] sm:$0xff] }
 0x1fb   :  { %1098 = vmatmul.f32.vlgmr.msra.gmra.mxu3 %v4218_v30  ;;  %1144 = vmatmul.f32.vlgmr.msra.gmra.mxu2 %v4218_v30 }
 0x1fc   :  { %1280 = vmatpush.msrb.mxu3 %v4247_v43  ;;  %1326 = vmatpush.msrb.mxu2 %v4248_v44  ;;  %v4297_v43 = vld [vmem:[#allocation93_spill] sm:$0xff]  ;;  %v4298_v44 = vld [vmem:[#allocation119_spill] sm:$0xff] }
 0x1fd   :  { %1120 = vmatpush.msra.mxu1 %v4249_v45  ;;  %1166 = vmatpush.msra.mxu0 %v4250_v47  ;;  %v1180_v45 = vsel %vm1174_vm4, %v1178_v34, %v1179_v36  ;;  %v4299_v47 = vld [vmem:[#allocation90_spill] sm:$0xff]  ;;  %v4336_v34 = vld [vmem:[#allocation192_spill] sm:$0xff]  ;;  %v4337_v36 = vld [vmem:[#allocation159_spill] sm:$0xff] }
 0x1fe   :  { %1281 = vmatpush.msrb.mxu3 %v4252_v50  ;;  %1327 = vmatpush.msrb.mxu2 %v4254_v52  ;;  %v4301_v50 = vld [vmem:[#allocation91_spill] sm:$0xff]  ;;  %v1175_v52 = vrot.slane %v4218_v30, 2 }
 0x1ff   :  { %1255 = vmatpush.msrb.mxu1 %v4251_v49  ;;  %1301 = vmatpush.msrb.mxu0 %v4253_v51  ;;  %v4300_v49 = vld [vmem:[#allocation116_spill] sm:$0xff]  ;;  %v4302_v51 = vld [vmem:[#allocation117_spill] sm:$0xff] }
 0x200   :  { %1282 = vmatpush.msrb.mxu3 %v4256_v54  ;;  %1328 = vmatpush.msrb.mxu2 %v4258_v56  ;;  %v4303_v54 = vld [vmem:[#allocation174_spill] sm:$0xff]  ;;  %v4305_v56 = vld [vmem:[#allocation88_spill] sm:$0xff] }
 0x201   :  { %1256 = vmatpush.msrb.mxu1 %v4255_v53  ;;  %1302 = vmatpush.msrb.mxu0 %v4257_v55  ;;  %v1176_v53 = vrot.slane %v3497_v48, 2  ;;  %v4304_v55 = vld [vmem:[#allocation175_spill] sm:$0xff] }
 0x202   :  { %1283 = vmatpush.msrb.mxu3 %v4260_v58  ;;  %1329 = vmatpush.msrb.mxu2 %v4262_v60  ;;  %v4307_v58 = vld [vmem:[#allocation172_spill] sm:$0xff]  ;;  %v1186_v60 = vrot.slane %v3499_v37, 6 }
 0x203   :  { %1257 = vmatpush.msrb.mxu1 %v4259_v57  ;;  %1303 = vmatpush.msrb.mxu0 %v4261_v59  ;;  %v4306_v57 = vld [vmem:[#allocation89_spill] sm:$0xff] }
 0x204   :  { %1737 = vmatmul.msk.f32.vlgmr.msra.gmra.mxu1 %vm706_vm0, %v3495_v12  ;;  %1739 = vmatmul.msk.f32.vlgmr.msra.gmra.mxu0 %vm706_vm0, %v3495_v12  ;;  %v4308_v59 = vld [vmem:[#allocation173_spill] sm:$0xff] }
 0x205   :  { %1258 = vmatpush.msrb.mxu1 %v4263_v61  ;;  %1284 = vmatpush.msrb.mxu3 %v4264_v31  ;;  %v1187_v61 = vrot.slane %v3503_v46, 6  ;;  %v4309_v31 = vld [vmem:[#allocation86_spill] sm:$0xff] }
 0x206   :  { %1304 = vmatpush.msrb.mxu0 %v4265_v27  ;;  %1330 = vmatpush.msrb.mxu2 %v4266_v63  ;;  %v4310_v27 = vld [vmem:[#allocation87_spill] sm:$0xff]  ;;  %v1177_v63 = vsel %vm1174_vm4, %v1175_v52, %v1176_v53  ;;  %v4351_v53 = vld [vmem:[#allocation150_spill] sm:$0xff] }
 0x207   :  { %1259 = vmatpush.msrb.mxu1 %v4267_v29  ;;  %1285 = vmatpush.msrb.mxu3 %v4268_v28  ;;  %v4311_v29 = vld [vmem:[#allocation170_spill] sm:$0xff]  ;;  %v4312_v28 = vld [vmem:[#allocation171_spill] sm:$0xff] }
 0x208   :  { %1305 = vmatpush.msrb.mxu0 %v4269_v62  ;;  %1331 = vmatpush.msrb.mxu2 %v4270_v32  ;;  %v4313_v62 = vld [vmem:[#allocation84_spill] sm:$0xff]  ;;  %v4314_v32 = vld [vmem:[#allocation85_spill] sm:$0xff]  ;;  %v4350_v52 = vld [vmem:[#allocation187_spill] sm:$0xff] }
 0x209   :  { %1260 = vmatpush.msrb.mxu1 %v4271_v33  ;;  %1286 = vmatpush.msrb.mxu3 %v4272_v15  ;;  %v1188_v33 = vsel %vm1182_vm5, %v1186_v60, %v1187_v61  ;;  %v4315_v15 = vld [vmem:[#allocation168_spill] sm:$0xff]  ;;  %v4356_v60 = vld [vmem:[#allocation182_spill] sm:$0xff]  ;;  %v4357_v61 = vld [vmem:[#allocation149_spill] sm:$0xff] }
 0x20a   :  { %1306 = vmatpush.msrb.mxu0 %v4273_v26  ;;  %1332 = vmatpush.msrb.mxu2 %v4274_v35  ;;  %v4316_v26 = vld [vmem:[#allocation202_spill] sm:$0xff]  ;;  %v4317_v35 = vld [vmem:[#allocation169_spill] sm:$0xff] }
 0x20b   :  { %1261 = vmatpush.msrb.mxu1 %v4275_v4  ;;  %1287 = vmatpush.msrb.mxu3 %v4276_v6  ;;  %v1183_v4 = vrot.slane %v3497_v48, 6  ;;  %v1184_v6 = vrot.slane %v3501_v1, 6 }
 0x20c   :  { %1307 = vmatpush.msrb.mxu0 %v4277_v5  ;;  %1333 = vmatpush.msrb.mxu2 %v4278_v7  ;;  %v4319_v5 = vld [vmem:[#allocation166_spill] sm:$0xff]  ;;  %v4320_v7 = vld [vmem:[#allocation200_spill] sm:$0xff] }
 0x20d   :  { %1262 = vmatpush.msrb.mxu1 %v4279_v8  ;;  %1288 = vmatpush.msrb.mxu3 %v4280_v9  ;;  %v4321_v8 = vld [vmem:[#allocation167_spill] sm:$0xff]  ;;  %v4322_v9 = vld [vmem:[#allocation201_spill] sm:$0xff] }
 0x20e   :  { %1308 = vmatpush.msrb.mxu0 %v4281_v2  ;;  %1334 = vmatpush.msrb.mxu2 %v4282_v10  ;;  %v4323_v2 = vld [vmem:[#allocation164_spill] sm:$0xff]  ;;  %v4324_v10 = vld [vmem:[#allocation198_spill] sm:$0xff] }
 0x20f   :  { %1263 = vmatpush.msrb.mxu1 %v4283_v13  ;;  %1289 = vmatpush.msrb.mxu3 %v4284_v14  ;;  %v4326_v13 = vld [vmem:[#allocation199_spill] sm:$0xff]  ;;  %v1185_v14 = vsel %vm1182_vm5, %v1183_v4, %v1184_v6  ;;  %v4367_v4 = vld [vmem:[#allocation262_spill] sm:$0xff] }
 0x210   :  { %1309 = vmatpush.msrb.mxu0 %v4285_v16  ;;  %1335 = vmatpush.msrb.mxu2 %v4286_v17  ;;  %v4327_v16 = vld [vmem:[#allocation162_spill] sm:$0xff]  ;;  %v4328_v17 = vld [vmem:[#allocation196_spill] sm:$0xff]  ;;  %v4368_v6 = vld [vmem:[#allocation263_spill] sm:$0xff] }
 0x211   :  { %1101 = vmatmul.f32.gmra.mxu3 %v838_v11  ;;  %1147 = vmatmul.f32.gmra.mxu2 %v838_v11  ;;  %v4325_v11 = vld [vmem:[#allocation165_spill] sm:$0xff] }
 0x212   :  { %1264 = vmatpush.msrb.mxu1 %v4287_v20  ;;  %1290 = vmatpush.msrb.mxu3 %v4288_v21  ;;  %v4330_v20 = vld [vmem:[#allocation197_spill] sm:$0xff]  ;;  %v4331_v21 = vld [vmem:[#allocation160_spill] sm:$0xff] }
 0x213   :  { %1310 = vmatpush.msrb.mxu0 %v4289_v22  ;;  %1336 = vmatpush.msrb.mxu2 %v4290_v23  ;;  %v4332_v22 = vld [vmem:[#allocation194_spill] sm:$0xff]  ;;  %v4333_v23 = vld [vmem:[#allocation161_spill] sm:$0xff] }
 0x214   :  { %1265 = vmatpush.msrb.mxu1 %v4291_v24  ;;  %1291 = vmatpush.msrb.mxu3 %v4292_v25  ;;  %v4334_v24 = vld [vmem:[#allocation195_spill] sm:$0xff]  ;;  %v4335_v25 = vld [vmem:[#allocation158_spill] sm:$0xff] }
 0x215   :  { %1311 = vmatpush.msrb.mxu0 %v4293_v38  ;;  %1337 = vmatpush.msrb.mxu2 %v4294_v39  ;;  %v4338_v38 = vld [vmem:[#allocation193_spill] sm:$0xff]  ;;  %v4339_v39 = vld [vmem:[#allocation156_spill] sm:$0xff] }
 0x216   :  { %1266 = vmatpush.msrb.mxu1 %v4295_v41  ;;  %1292 = vmatpush.msrb.mxu3 %v4296_v42  ;;  %v4341_v41 = vld [vmem:[#allocation157_spill] sm:$0xff]  ;;  %v4342_v42 = vld [vmem:[#allocation191_spill] sm:$0xff] }
 0x217   :  { %1312 = vmatpush.msrb.mxu0 %v4297_v43  ;;  %1338 = vmatpush.msrb.mxu2 %v4298_v44  ;;  %v4343_v43 = vld [vmem:[#allocation154_spill] sm:$0xff]  ;;  %v4344_v44 = vld [vmem:[#allocation188_spill] sm:$0xff] }
 0x218   :  { %1738 = vmatmul.msk.f32.gmra.mxu1 %vm706_vm0, %v841_v40  ;;  %1740 = vmatmul.msk.f32.gmra.mxu0 %vm706_vm0, %v841_v40  ;;  %v4340_v40 = vld [vmem:[#allocation190_spill] sm:$0xff] }
 0x219   :  { %1267 = vmatpush.msrb.mxu1 %v4299_v47  ;;  %1293 = vmatpush.msrb.mxu3 %v4300_v49  ;;  %v4346_v47 = vld [vmem:[#allocation189_spill] sm:$0xff]  ;;  %v4347_v49 = vld [vmem:[#allocation152_spill] sm:$0xff] }
 0x21a   :  { %1313 = vmatpush.msrb.mxu0 %v4301_v50  ;;  %1339 = vmatpush.msrb.mxu2 %v4302_v51  ;;  %v4348_v50 = vld [vmem:[#allocation186_spill] sm:$0xff]  ;;  %v4349_v51 = vld [vmem:[#allocation153_spill] sm:$0xff] }
 0x21b   :  { %1741 = vmatmul.msk.f32.vlgmr.msrb.gmra.mxu3 %vm706_vm0, %v1180_v45  ;;  %1743 = vmatmul.msk.f32.vlgmr.msrb.gmra.mxu2 %vm706_vm0, %v1180_v45  ;;  %v4345_v45 = vld [vmem:[#allocation155_spill] sm:$0xff] }
 0x21c   :  { %1432 = vmatpush.msra.mxu3 %v4303_v54  ;;  %1478 = vmatpush.msra.mxu2 %v4304_v55  ;;  %v4352_v54 = vld [vmem:[#allocation184_spill] sm:$0xff]  ;;  %v4353_v55 = vld [vmem:[#allocation151_spill] sm:$0xff] }
 0x21d   :  { %1268 = vmatpush.msrb.mxu1 %v4305_v56  ;;  %1314 = vmatpush.msrb.mxu0 %v4306_v57  ;;  %v4354_v56 = vld [vmem:[#allocation185_spill] sm:$0xff]  ;;  %v1352_v57 = vrot.slane %v4218_v30, 3 }
 0x21e   :  { %1433 = vmatpush.msra.mxu3 %v4307_v58  ;;  %1479 = vmatpush.msra.mxu2 %v4308_v59  ;;  %v1353_v58 = vrot.slane %v3497_v48, 3  ;;  %v4355_v59 = vld [vmem:[#allocation148_spill] sm:$0xff] }
 0x21f   :  { %1269 = vmatpush.msrb.mxu1 %v4309_v31  ;;  %1315 = vmatpush.msrb.mxu0 %v4310_v27  ;;  %v4358_v31 = vld [vmem:[#allocation183_spill] sm:$0xff]  ;;  %v4359_v27 = vld [vmem:[#allocation146_spill] sm:$0xff] }
 0x220   :  { %1434 = vmatpush.msra.mxu3 %v4311_v29  ;;  %1480 = vmatpush.msra.mxu2 %v4312_v28  ;;  %v4361_v29 = vld [vmem:[#allocation147_spill] sm:$0xff]  ;;  %v4362_v28 = vld [vmem:[#allocation181_spill] sm:$0xff] }
 0x221   :  { %1270 = vmatpush.msrb.mxu1 %v4313_v62  ;;  %1316 = vmatpush.msrb.mxu0 %v4314_v32  ;;  %v1354_v62 = vsel %vm1351_vm6, %v1352_v57, %v1353_v58  ;;  %v4363_v32 = vld [vmem:[#allocation144_spill] sm:$0xff]  ;;  %v4400_v58 = vld [vmem:[#allocation246_spill] sm:$0xff] }
 0x222   :  { %1271 = vmatmul.f32.vlgmr.msrb.gmra.mxu1 %v1177_v63  ;;  %1317 = vmatmul.f32.vlgmr.msrb.gmra.mxu0 %v1177_v63  ;;  %v4360_v63 = vld [vmem:[#allocation180_spill] sm:$0xff] }
 0x223   :  { %1435 = vmatpush.msra.mxu3 %v4315_v15  ;;  %1457 = vmatpush.msra.mxu1 %v4316_v26  ;;  %v4365_v15 = vld [vmem:[#allocation145_spill] sm:$0xff]  ;;  %v4366_v26 = vld [vmem:[#allocation179_spill] sm:$0xff]  ;;  %v4399_v57 = vld [vmem:[#allocation220_spill] sm:$0xff] }
 0x224   :  { %1481 = vmatpush.msra.mxu2 %v4317_v35  ;;  %1503 = vmatpush.msra.mxu0 %v4318_v3  ;;  %v1355_v35 = vrot.slane %v3495_v12, 3  ;;  %v1356_v3 = vrot.slane %v3499_v37, 3 }
 0x225   :  { %1742 = vmatmul.msk.f32.gmra.mxu3 %vm706_vm0, %v1188_v33  ;;  %1744 = vmatmul.msk.f32.gmra.mxu2 %vm706_vm0, %v1188_v33  ;;  %v4364_v33 = vld [vmem:[#allocation178_spill] sm:$0xff] }
 0x226   :  { %1436 = vmatpush.msra.mxu3 %v4319_v5  ;;  %1458 = vmatpush.msra.mxu1 %v4320_v7  ;;  %v4369_v5 = vld [vmem:[#allocation176_spill] sm:$0xff]  ;;  %v4370_v7 = vld [vmem:[#allocation177_spill] sm:$0xff] }
 0x227   :  { %1482 = vmatpush.msra.mxu2 %v4321_v8  ;;  %1504 = vmatpush.msra.mxu0 %v4322_v9  ;;  %v4371_v8 = vld [vmem:[#allocation234_spill] sm:$0xff]  ;;  %v4372_v9 = vld [vmem:[#allocation260_spill] sm:$0xff] }
 0x228   :  { %1437 = vmatpush.msra.mxu3 %v4323_v2  ;;  %1459 = vmatpush.msra.mxu1 %v4324_v10  ;;  %v1360_v2 = vrot.slane %v3497_v48, 7  ;;  %v1361_v10 = vrot.slane %v3501_v1, 7 }
 0x229   :  { %1483 = vmatpush.msra.mxu2 %v4325_v11  ;;  %1505 = vmatpush.msra.mxu0 %v4326_v13  ;;  %v4373_v11 = vld [vmem:[#allocation235_spill] sm:$0xff]  ;;  %v4374_v13 = vld [vmem:[#allocation261_spill] sm:$0xff] }
 0x22a   :  { %1438 = vmatpush.msra.mxu3 %v4327_v16  ;;  %1460 = vmatpush.msra.mxu1 %v4328_v17  ;;  %v4375_v16 = vld [vmem:[#allocation232_spill] sm:$0xff]  ;;  %v4376_v17 = vld [vmem:[#allocation258_spill] sm:$0xff] }
 0x22b   :  { %1484 = vmatpush.msra.mxu2 %v4329_v19  ;;  %1506 = vmatpush.msra.mxu0 %v4330_v20  ;;  %v4377_v19 = vld [vmem:[#allocation233_spill] sm:$0xff]  ;;  %v4378_v20 = vld [vmem:[#allocation259_spill] sm:$0xff] }
 0x22c   :  { %1274 = vmatmul.f32.gmra.mxu1 %v1185_v14  ;;  %1320 = vmatmul.f32.gmra.mxu0 %v1185_v14  ;;  %v1357_v14 = vsel %vm1351_vm6, %v1355_v35, %v1356_v3  ;;  %v4413_v35 = vld [vmem:[#allocation215_spill] sm:$0xff]  ;;  %v4414_v3 = vld [vmem:[#allocation241_spill] sm:$0xff] }
 0x22d   :  { %1439 = vmatpush.msra.mxu3 %v4331_v21  ;;  %1461 = vmatpush.msra.mxu1 %v4332_v22  ;;  %v1362_v21 = vsel %vm1359_vm7, %v1360_v2, %v1361_v10  ;;  %v4379_v22 = vld [vmem:[#allocation230_spill] sm:$0xff]  ;;  %v4421_v2 = vld [vmem:[#allocation211_spill] sm:$0xff]  ;;  %v4422_v10 = vld [vmem:[#allocation237_spill] sm:$0xff] }
 0x22e   :  { %1485 = vmatpush.msra.mxu2 %v4333_v23  ;;  %1507 = vmatpush.msra.mxu0 %v4334_v24  ;;  %v4380_v23 = vld [vmem:[#allocation256_spill] sm:$0xff]  ;;  %v4381_v24 = vld [vmem:[#allocation231_spill] sm:$0xff] }
 0x22f   :  { %1440 = vmatpush.msra.mxu3 %v4335_v25  ;;  %1462 = vmatpush.msra.mxu1 %v4336_v34  ;;  %v4382_v25 = vld [vmem:[#allocation257_spill] sm:$0xff]  ;;  %v1363_v34 = vrot.slane %v3499_v37, 7  ;;  %v4425_v37 = vld [vmem:[#allocation206_spill] sm:$0xff] }
 0x230   :  { %1486 = vmatpush.msra.mxu2 %v4337_v36  ;;  %1508 = vmatpush.msra.mxu0 %v4338_v38  ;;  %v1364_v36 = vrot.slane %v3503_v46, 7  ;;  %v4383_v38 = vld [vmem:[#allocation228_spill] sm:$0xff] }
 0x231   :  { %1441 = vmatpush.msra.mxu3 %v4339_v39  ;;  %1463 = vmatpush.msra.mxu1 %v4340_v40  ;;  %v4384_v39 = vld [vmem:[#allocation254_spill] sm:$0xff]  ;;  %v4385_v40 = vld [vmem:[#allocation229_spill] sm:$0xff] }
 0x232   :  { %1487 = vmatpush.msra.mxu2 %v4341_v41  ;;  %1509 = vmatpush.msra.mxu0 %v4342_v42  ;;  %v4386_v41 = vld [vmem:[#allocation255_spill] sm:$0xff]  ;;  %v4387_v42 = vld [vmem:[#allocation226_spill] sm:$0xff] }
 0x233   :  { %1442 = vmatpush.msra.mxu3 %v4343_v43  ;;  %1464 = vmatpush.msra.mxu1 %v4344_v44  ;;  %v4388_v43 = vld [vmem:[#allocation252_spill] sm:$0xff]  ;;  %v4389_v44 = vld [vmem:[#allocation227_spill] sm:$0xff] }
 0x234   :  { %1488 = vmatpush.msra.mxu2 %v4345_v45  ;;  %1510 = vmatpush.msra.mxu0 %v4346_v47  ;;  %v4390_v45 = vld [vmem:[#allocation253_spill] sm:$0xff]  ;;  %v1365_v47 = vsel %vm1359_vm7, %v1363_v34, %v1364_v36 }
 0x235   :  { %1443 = vmatpush.msra.mxu3 %v4347_v49  ;;  %1465 = vmatpush.msra.mxu1 %v4348_v50  ;;  %v4391_v49 = vld [vmem:[#allocation224_spill] sm:$0xff]  ;;  %v4392_v50 = vld [vmem:[#allocation250_spill] sm:$0xff] }
 0x236   :  { %1489 = vmatpush.msra.mxu2 %v4349_v51  ;;  %1511 = vmatpush.msra.mxu0 %v4350_v52  ;;  %v4393_v51 = vld [vmem:[#allocation225_spill] sm:$0xff]  ;;  %v4394_v52 = vld [vmem:[#allocation251_spill] sm:$0xff] }
 0x237   :  { %1444 = vmatpush.msra.mxu3 %v4351_v53  ;;  %1466 = vmatpush.msra.mxu1 %v4352_v54  ;;  %v4395_v53 = vld [vmem:[#allocation222_spill] sm:$0xff]  ;;  %v4396_v54 = vld [vmem:[#allocation248_spill] sm:$0xff] }
 0x238   :  { %1490 = vmatpush.msra.mxu2 %v4353_v55  ;;  %1512 = vmatpush.msra.mxu0 %v4354_v56  ;;  %v4397_v55 = vld [vmem:[#allocation223_spill] sm:$0xff]  ;;  %v4398_v56 = vld [vmem:[#allocation249_spill] sm:$0xff] }
 0x239   :  { %1445 = vmatpush.msra.mxu3 %v4355_v59  ;;  %1467 = vmatpush.msra.mxu1 %v4356_v60  ;;  %v4401_v59 = vld [vmem:[#allocation221_spill] sm:$0xff]  ;;  %v4402_v60 = vld [vmem:[#allocation247_spill] sm:$0xff] }
 0x23a   :  { %1491 = vmatpush.msra.mxu2 %v4357_v61  ;;  %1513 = vmatpush.msra.mxu0 %v4358_v31  ;;  %v4403_v61 = vld [vmem:[#allocation218_spill] sm:$0xff]  ;;  %v4404_v31 = vld [vmem:[#allocation244_spill] sm:$0xff] }
 0x23b   :  { %1446 = vmatpush.msra.mxu3 %v4359_v27  ;;  %1468 = vmatpush.msra.mxu1 %v4360_v63  ;;  %v4405_v27 = vld [vmem:[#allocation219_spill] sm:$0xff]  ;;  %v4406_v63 = vld [vmem:[#allocation245_spill] sm:$0xff] }
 0x23c   :  { %1492 = vmatpush.msra.mxu2 %v4361_v29  ;;  %1514 = vmatpush.msra.mxu0 %v4362_v28  ;;  %v4407_v29 = vld [vmem:[#allocation216_spill] sm:$0xff]  ;;  %v4408_v28 = vld [vmem:[#allocation242_spill] sm:$0xff] }
 0x23d   :  { %1447 = vmatpush.msra.mxu3 %v4363_v32  ;;  %1469 = vmatpush.msra.mxu1 %v4364_v33  ;;  %v4410_v32 = vld [vmem:[#allocation243_spill] sm:$0xff]  ;;  %v1530_v33 = vrot.slane %v3495_v12, 4 }
 0x23e   :  { %1493 = vmatpush.msra.mxu2 %v4365_v15  ;;  %1515 = vmatpush.msra.mxu0 %v4366_v26  ;;  %v4411_v15 = vld [vmem:[#allocation214_spill] sm:$0xff]  ;;  %v4412_v26 = vld [vmem:[#allocation240_spill] sm:$0xff] }
 0x23f   :  { %1448 = vmatmul.f32.vlgmr.msra.gmra.mxu3 %v1354_v62  ;;  %1494 = vmatmul.f32.vlgmr.msra.gmra.mxu2 %v1354_v62  ;;  %v4409_v62 = vld [vmem:[#allocation217_spill] sm:$0xff]  ;;  %v1531_v12 = vsel %vm835_vm3, %v1530_v33, %v839_v18  ;;  %v4426_v18 = vld [vmem:[#allocation207_spill] sm:$0xff] }
 0x240   :  { %1623 = vmatpush.msrb.mxu3 %v4367_v4  ;;  %1669 = vmatpush.msrb.mxu2 %v4368_v6  ;;  %v4415_v4 = vld [vmem:[#allocation212_spill] sm:$0xff]  ;;  %v4416_v6 = vld [vmem:[#allocation238_spill] sm:$0xff] }
 0x241   :  { %1470 = vmatpush.msra.mxu1 %v4369_v5  ;;  %1516 = vmatpush.msra.mxu0 %v4370_v7  ;;  %v4417_v5 = vld [vmem:[#allocation213_spill] sm:$0xff]  ;;  %v4418_v7 = vld [vmem:[#allocation239_spill] sm:$0xff] }
 0x242   :  { %1624 = vmatpush.msrb.mxu3 %v4372_v9  ;;  %1670 = vmatpush.msrb.mxu2 %v4374_v13  ;;  %v4420_v9 = vld [vmem:[#allocation236_spill] sm:$0xff] }
 0x243   :  { %1598 = vmatpush.msrb.mxu1 %v4371_v8  ;;  %1644 = vmatpush.msrb.mxu0 %v4373_v11  ;;  %v4419_v8 = vld [vmem:[#allocation210_spill] sm:$0xff]  ;;  %v1528_v11 = vrot.slane %v4218_v30, 4  ;;  %v4423_v13 = vld [vmem:[#allocation208_spill] sm:$0xff] }
 0x244   :  { %1625 = vmatpush.msrb.mxu3 %v4376_v17  ;;  %1671 = vmatpush.msrb.mxu2 %v4378_v20  ;;  %v4427_v17 = vld [vmem:[#allocation204_spill] sm:$0xff] }
 0x245   :  { %1599 = vmatpush.msrb.mxu1 %v4375_v16  ;;  %1645 = vmatpush.msrb.mxu0 %v4377_v19  ;;  %v1529_v16 = vsel %vm835_vm3, %v1528_v11, %v836_v0  ;;  %v4428_v19 = vld [vmem:[#allocation205_spill] sm:$0xff] }
 0x246   :  { %1745 = vmatmul.msk.f32.vlgmr.msra.gmra.mxu1 %vm706_vm0, %v1357_v14  ;;  %1747 = vmatmul.msk.f32.vlgmr.msra.gmra.mxu0 %vm706_vm0, %v1357_v14  ;;  %v4424_v14 = vld [vmem:[#allocation209_spill] sm:$0xff] }
 0x247   :  { %1600 = vmatpush.msrb.mxu1 %v4379_v22  ;;  %1626 = vmatpush.msrb.mxu3 %v4380_v23 }
 0x248   :  { %1646 = vmatpush.msrb.mxu0 %v4381_v24  ;;  %1672 = vmatpush.msrb.mxu2 %v4382_v25 }
 0x249   :  { %1451 = vmatmul.f32.gmra.mxu3 %v1362_v21  ;;  %1497 = vmatmul.f32.gmra.mxu2 %v1362_v21 }
 0x24a   :  { %1601 = vmatpush.msrb.mxu1 %v4383_v38  ;;  %1627 = vmatpush.msrb.mxu3 %v4384_v39 }
 0x24b   :  { %1647 = vmatpush.msrb.mxu0 %v4385_v40  ;;  %1673 = vmatpush.msrb.mxu2 %v4386_v41 }
 0x24c   :  { %1602 = vmatpush.msrb.mxu1 %v4387_v42  ;;  %1628 = vmatpush.msrb.mxu3 %v4388_v43 }
 0x24d   :  { %1648 = vmatpush.msrb.mxu0 %v4389_v44  ;;  %1674 = vmatpush.msrb.mxu2 %v4390_v45 }
 0x24e   :  { %1603 = vmatpush.msrb.mxu1 %v4391_v49  ;;  %1629 = vmatpush.msrb.mxu3 %v4392_v50 }
 0x24f   :  { %1649 = vmatpush.msrb.mxu0 %v4393_v51  ;;  %1675 = vmatpush.msrb.mxu2 %v4394_v52 }
 0x250   :  { %1746 = vmatmul.msk.f32.gmra.mxu1 %vm706_vm0, %v1365_v47  ;;  %1748 = vmatmul.msk.f32.gmra.mxu0 %vm706_vm0, %v1365_v47 }
 0x251   :  { %1604 = vmatpush.msrb.mxu1 %v4395_v53  ;;  %1630 = vmatpush.msrb.mxu3 %v4396_v54 }
 0x252   :  { %1650 = vmatpush.msrb.mxu0 %v4397_v55  ;;  %1676 = vmatpush.msrb.mxu2 %v4398_v56 }
 0x253   :  { %1605 = vmatpush.msrb.mxu1 %v4399_v57  ;;  %1631 = vmatpush.msrb.mxu3 %v4400_v58 }
 0x254   :  { %1651 = vmatpush.msrb.mxu0 %v4401_v59  ;;  %1677 = vmatpush.msrb.mxu2 %v4402_v60 }
 0x255   :  { %1606 = vmatpush.msrb.mxu1 %v4403_v61  ;;  %1632 = vmatpush.msrb.mxu3 %v4404_v31 }
 0x256   :  { %1652 = vmatpush.msrb.mxu0 %v4405_v27  ;;  %1678 = vmatpush.msrb.mxu2 %v4406_v63 }
 0x257   :  { %1607 = vmatpush.msrb.mxu1 %v4407_v29  ;;  %1633 = vmatpush.msrb.mxu3 %v4408_v28 }
 0x258   :  { %1653 = vmatpush.msrb.mxu0 %v4409_v62  ;;  %1679 = vmatpush.msrb.mxu2 %v4410_v32 }
 0x259   :  { %1608 = vmatpush.msrb.mxu1 %v4411_v15  ;;  %1634 = vmatpush.msrb.mxu3 %v4412_v26  ;;  %v1694_v26 = vld [vmem:[%s3908_s4] sm:$0x3] }
 0x25a   :  { %1654 = vmatpush.msrb.mxu0 %v4413_v35  ;;  %1680 = vmatpush.msrb.mxu2 %v4414_v3 }
 0x25b   :  { %1609 = vmatpush.msrb.mxu1 %v4415_v4  ;;  %1635 = vmatpush.msrb.mxu3 %v4416_v6 }
 0x25c   :  { %1655 = vmatpush.msrb.mxu0 %v4417_v5  ;;  %1681 = vmatpush.msrb.mxu2 %v4418_v7 }
 0x25d   :  { %1610 = vmatpush.msrb.mxu1 %v4419_v8  ;;  %1636 = vmatpush.msrb.mxu3 %v4420_v9  ;;  %v1696_v8 = vperm.slane %v1694_v26, 0 }
 0x25e   :  { %1656 = vmatpush.msrb.mxu0 %v4421_v2  ;;  %1682 = vmatpush.msrb.mxu2 %v4422_v10 }
 0x25f   :  { %1749 = vmatmul.msk.f32.vlgmr.msrb.gmra.mxu3 %vm706_vm0, %v1531_v12  ;;  %1751 = vmatmul.msk.f32.vlgmr.msrb.gmra.mxu2 %vm706_vm0, %v1531_v12 }
 0x260   :  { %1611 = vmatpush.msrb.mxu1 %v4423_v13  ;;  %1657 = vmatpush.msrb.mxu0 %v4424_v14  ;;  %v1697_v14 = vperm.slane %v1694_v26, 1 }
 0x262   :  { %1612 = vmatpush.msrb.mxu1 %v4425_v37  ;;  %1658 = vmatpush.msrb.mxu0 %v4426_v18 }
 0x264   :  { %1613 = vmatpush.msrb.mxu1 %v4427_v17  ;;  %1659 = vmatpush.msrb.mxu0 %v4428_v19 }
 0x265   :  { %1614 = vmatmul.f32.vlgmr.msrb.gmra.mxu1 %v1529_v16  ;;  %1660 = vmatmul.f32.vlgmr.msrb.gmra.mxu0 %v1529_v16 }
 0x267   :  { %1750 = vmatmul.msk.f32.gmra.mxu3 %vm706_vm0, %v3503_v46  ;;  %1752 = vmatmul.msk.f32.gmra.mxu2 %vm706_vm0, %v3503_v46 }
 0x26a   :  { %v1026_v30 = vpop.f32.mrf.mxu3  ;;  %v1072_v20 = vpop.f32.mrf.mxu2 }
 0x26d   :  { %1617 = vmatmul.f32.gmra.mxu1 %v3501_v1  ;;  %1663 = vmatmul.f32.gmra.mxu0 %v3501_v1  ;;  %v1003_v48 = vpop.f32.mrf.mxu1 }
 0x26e   :  { %v1049_v0 = vpop.f32.mrf.mxu0  ;;  %v1027_v55 = vadd.f32 %v1026_v30, %v1003_v48 }
 0x26f   :  { %v1073_v56 = vadd.f32 %v1072_v20, %v1049_v0 }
 0x273   :  { %v1029_v21 = vpop.f32.mrf.mxu3 }
 0x274   :  { %v1075_v23 = vpop.f32.mrf.mxu2 }
 0x277   :  { %v1006_v22 = vpop.f32.mrf.mxu1  ;;  %v1052_v24 = vpop.f32.mrf.mxu0 }
 0x278   :  { %v1030_v29 = vadd.f32 %v1029_v21, %v1006_v22  ;;  %v1076_v32 = vadd.f32 %v1075_v23, %v1052_v24 }
 0x27e   :  { %v1099_v25 = vpop.f32.mrf.mxu3  ;;  %v1145_v36 = vpop.f32.mrf.mxu2 }
 0x27f   :  { %v1100_v59 = vadd.f32 %v1099_v25, %v1027_v55  ;;  %v1146_v31 = vadd.f32 %v1145_v36, %v1073_v56 }
 0x281   :  { %v1122_v34 = vpop.f32.mrf.mxu1  ;;  %v1168_v38 = vpop.f32.mrf.mxu0 }
 0x282   :  { %v1123_v28 = vadd.f32 %v1122_v34, %v1100_v59  ;;  %v1169_v33 = vadd.f32 %v1168_v38, %v1146_v31 }
 0x294   :  { %v1102_v39 = vpop.f32.mrf.mxu3  ;;  %v1148_v41 = vpop.f32.mrf.mxu2 }
 0x295   :  { %v1125_v40 = vpop.f32.mrf.mxu1  ;;  %v1171_v46 = vpop.f32.mrf.mxu0  ;;  %v1103_v5 = vadd.f32 %v1102_v39, %v1030_v29  ;;  %v1149_v10 = vadd.f32 %v1148_v41, %v1076_v32 }
 0x297   :  { %v1126_v19 = vadd.f32 %v1125_v40, %v1103_v5  ;;  %v1172_v20 = vadd.f32 %v1171_v46, %v1149_v10 }
 0x29e   :  { %v1295_v43 = vpop.f32.mrf.mxu3  ;;  %v1341_v1 = vpop.f32.mrf.mxu2 }
 0x29f   :  { %v1272_v42 = vpop.f32.mrf.mxu1  ;;  %v1318_v44 = vpop.f32.mrf.mxu0 }
 0x2a0   :  { %v1296_v27 = vadd.f32 %v1295_v43, %v1272_v42  ;;  %v1342_v63 = vadd.f32 %v1341_v1, %v1318_v44 }
 0x2a2   :  { %v1347_v35 = vadd.f32 %v1296_v27, %v1123_v28  ;;  %v1348_v3 = vadd.f32 %v1342_v63, %v1169_v33 }
 0x2a8   :  { %v1298_v47 = vpop.f32.mrf.mxu3  ;;  %v1344_v50 = vpop.f32.mrf.mxu2 }
 0x2a9   :  { %v1275_v45 = vpop.f32.mrf.mxu1  ;;  %v1321_v49 = vpop.f32.mrf.mxu0 }
 0x2aa   :  { %v1299_v37 = vadd.f32 %v1298_v47, %v1275_v45  ;;  %v1345_v16 = vadd.f32 %v1344_v50, %v1321_v49 }
 0x2ac   :  { %v1349_v22 = vadd.f32 %v1299_v37, %v1126_v19  ;;  %v1350_v24 = vadd.f32 %v1345_v16, %v1172_v20 }
 0x2c2   :  { %v1449_v51 = vpop.f32.mrf.mxu3  ;;  %v1495_v53 = vpop.f32.mrf.mxu2 }
 0x2c3   :  { %v1472_v52 = vpop.f32.mrf.mxu1  ;;  %v1518_v54 = vpop.f32.mrf.mxu0 }
 0x2c4   :  { %v1473_v62 = vadd.f32 %v1472_v52, %v1449_v51  ;;  %v1519_v15 = vadd.f32 %v1518_v54, %v1495_v53 }
 0x2c6   :  { %v1524_v7 = vadd.f32 %v1473_v62, %v1347_v35  ;;  %v1525_v11 = vadd.f32 %v1519_v15, %v1348_v3 }
 0x2cc   :  { %v1452_v57 = vpop.f32.mrf.mxu3  ;;  %v1498_v60 = vpop.f32.mrf.mxu2 }
 0x2cd   :  { %v1475_v58 = vpop.f32.mrf.mxu1  ;;  %v1521_v61 = vpop.f32.mrf.mxu0 }
 0x2ce   :  { %v1476_v30 = vadd.f32 %v1475_v58, %v1452_v57  ;;  %v1522_v0 = vadd.f32 %v1521_v61, %v1498_v60 }
 0x2d0   :  { %v1526_v38 = vadd.f32 %v1476_v30, %v1349_v22  ;;  %v1527_v42 = vadd.f32 %v1522_v0, %v1350_v24 }
 0x2e2   :  { %v1615_v4 = vpop.f32.mrf.mxu1  ;;  %v1638_v6 = vpop.f32.mrf.mxu3 }
 0x2e3   :  { %v1639_v12 = vadd.f32 %v1638_v6, %v1615_v4  ;;  %v1661_v9 = vpop.f32.mrf.mxu0  ;;  %v1684_v2 = vpop.f32.mrf.mxu2 }
 0x2e4   :  { %v1685_v13 = vadd.f32 %v1684_v2, %v1661_v9 }
 0x2e5   :  { %v1690_v18 = vadd.f32 %v1639_v12, %v1524_v7 }
 0x2e6   :  { %v1691_v17 = vadd.f32 %v1685_v13, %v1525_v11 }
 0x2e7   :  { %v1700_v48 = vadd.f32 %v1696_v8, %v1690_v18 }
 0x2e8   :  { %v1701_v21 = vadd.f32 %v1697_v14, %v1691_v17 }
 0x2e9   :  { %v1704_v23 = vmax.f32 %v1700_v48, 0.0 }
 0x2ea   :  { %v1705_v25 = vmax.f32 %v1701_v21, 0.0  ;;  %v1618_v34 = vpop.f32.mrf.mxu1  ;;  %v1641_v36 = vpop.f32.mrf.mxu3 }
 0x2eb   :  { %1708 = vst [vmem:[%s3909_s5] sm:$0xff] %v1704_v23  ;;  %v1642_v39 = vadd.f32 %v1641_v36, %v1618_v34  ;;  %v1664_v41 = vpop.f32.mrf.mxu0  ;;  %v1687_v40 = vpop.f32.mrf.mxu2 }
 0x2ec   :  { %1710 = vst.msk [vmem:[%s3909_s5 + $0x8] sm:$0xff] %vm1709_vm8, %v1705_v25  ;;  %v1688_v46 = vadd.f32 %v1687_v40, %v1664_v41 }
 0x2ed   :  { %v1692_v43 = vadd.f32 %v1642_v39, %v1526_v38 }
 0x2ee   :  { %v1693_v44 = vadd.f32 %v1688_v46, %v1527_v42 }
 0x2ef   :  { %v1702_v1 = vadd.f32 %v1696_v8, %v1692_v43 }
 0x2f0   :  { %v1703_v45 = vadd.f32 %v1697_v14, %v1693_v44 }
 0x2f1   :  { %v1706_v47 = vmax.f32 %v1702_v1, 0.0 }
 0x2f2   :  { %v1707_v49 = vmax.f32 %v1703_v45, 0.0 }
 0x2f3   :  { %1711 = vst [vmem:[%s3909_s5 + $0x10] sm:$0xff] %v1706_v47 }
 0x2f4   :  { %1712 = vst.msk [vmem:[%s3909_s5 + $0x18] sm:$0xff] %vm1709_vm8, %v1707_v49 }
 0x2f5   :  { %1717 = vsyncmov [#allocation3] }
 0x2f8   :  { %s1718_s27 = vpop.sfrf %1717 }
 0x2f9   :  { %p1753_p0 = scmp.ne.s32.totalorder %s1718_s27, 0 }
 0x2fb   :  { %1722 = shalt.err (%p1753_p0)  }

</bundles_post_ra>
